<compile_context>
chip_gen: v7x
topology: tpu7x:2x2x1
jax: 0.10.0
libtpu: 0.0.40
codegen_flags: <defaults>
</compile_context>

<pallas_src>
import jax
import jax.numpy as jnp
from jax.experimental import pallas as pl
from jax.experimental.pallas import tpu as pltpu


def _pick_tq(N, tq=None):
    """Query-block width: bounds the (N, TQ) attention tile held per step."""
    if tq is not None:
        if N % tq != 0:
            raise ValueError(f"tq={tq} must divide N={N}")
        return tq
    if N <= 256:
        return N
    for cand in (512, 384, 256, 128):
        if N % cand == 0:
            return cand
    return N


def sa_layer(x, wq, wv, bv, wt, bt, gamma, beta, *, tq=None):
    B, C, N = x.shape
    C4 = wq.shape[0]
    if C % 32 != 0:
        raise ValueError("channels must be a multiple of 32 so the q/k vs v "
                         "row split of the fused projection stays sublane-aligned")
    TQ = _pick_tq(N, tq)
    NQ = N // TQ
    CP = ((C + 1 + 15) // 16) * 16      # stacked [v*rinv ; rinv] rows, bf16-padded

    f32 = jnp.float32
    bf16 = jnp.bfloat16

    # Loop-invariant weights: fuse shared-weight q/k with v, cast to bf16 once.
    wqv_bf = jnp.concatenate([wq, wv], axis=0).astype(bf16)   # (C4+C, C)
    wt_bf = wt.astype(bf16)                                   # (C, C)

    # ------------------------------------------------------------------ phase 1
    def phase1_kernel(x_ref, wqv_ref, bv_ref, wt_ref, bt_ref,
                      t_ref, stats_ref, qk_ref, v_ref, acc_ref):
        qi = pl.program_id(1)

        @pl.when(qi == 0)
        def _init():
            xb_bf = x_ref[0].astype(bf16)                     # (C, N)
            proj = jnp.dot(wqv_ref[...], xb_bf,
                           preferred_element_type=f32)        # (C4+C, N)
            qk_ref[...] = proj[:C4].astype(bf16)              # (C4, N)
            v_ref[...] = proj[C4:] + bv_ref[...]              # (C, N) f32
            acc_ref[...] = jnp.zeros_like(acc_ref)

        q0 = pl.multiple_of(qi * TQ, TQ)
        qk_blk = qk_ref[:, pl.ds(q0, TQ)]                     # (C4, TQ) bf16

        # Transposed energy tile: e_t[m, n] = sum_c qk[c, m] * qk[c, n]
        # -> softmax row max / sum come out lane-oriented (no transposes).
        e_t = jax.lax.dot_general(qk_ref[...], qk_blk,
                                  (((0,), (0,)), ((), ())),
                                  preferred_element_type=f32)  # (N, TQ)
        mx = jnp.max(e_t, axis=0, keepdims=True)               # (1, TQ)
        p_t = jnp.exp(e_t - mx)                                # (N, TQ) f32
        rsum = jnp.sum(p_t, axis=0, keepdims=True)             # (1, TQ)
        rinv = pl.reciprocal(rsum)                             # exact: sensitive denom

        # One MXU launch accumulates v@attn (rows 0..C-1) AND the attention
        # column sums (row C); remaining rows are zero padding for bf16 layout.
        v_blk = v_ref[:, pl.ds(q0, TQ)]                        # (C, TQ) f32
        lhs = jnp.concatenate(
            [v_blk * rinv, rinv, jnp.zeros((CP - C - 1, TQ), f32)],
            axis=0).astype(bf16)                               # (CP, TQ)
        acc_ref[...] += jax.lax.dot_general(
            lhs, p_t.astype(bf16), (((1,), (1,)), ((), ())),
            preferred_element_type=f32)                        # (CP, N)

        @pl.when(qi == NQ - 1)
        def _finish():
            col = acc_ref[C:C + 1, :]                          # (1, N) column sums
            cinv = pl.reciprocal(col + 1e-9, approx=True)
            x_r = acc_ref[:C, :] * cinv                        # (C, N)
            diff = (x_ref[0] - x_r).astype(bf16)
            t = jnp.dot(wt_ref[...], diff,
                        preferred_element_type=f32) + bt_ref[...]   # (C, N) f32
            t_ref[0] = t.astype(t_ref.dtype)
            # BatchNorm partial stats fused while t is live (single packed output).
            stats_ref[0] = jnp.concatenate(
                [jnp.sum(t, axis=1, keepdims=True),
                 jnp.sum(t * t, axis=1, keepdims=True)], axis=1)     # (C, 2)

    # Rough per-core VMEM footprint -> explicit scoped-VMEM limit.
    est1 = (2 * C * N * 4                                    # x blocks
            + 2 * C * N * 2                                  # bf16 t output blocks
            + 2 * ((C4 + C) * C * 2 + C * C * 2 + 4 * C * 4)  # weights/biases
            + C4 * N * 2 + C * N * 4 + CP * N * 4            # persistent scratch
            + 3 * N * TQ * 4 + 2 * CP * N * 4)               # per-step transients
    vmem1 = int(min(64 << 20, max(32 << 20, est1 * 3 // 2)))

    t_bf, stats = pl.pallas_call(
        phase1_kernel,
        grid=(B, NQ),
        in_specs=[
            pl.BlockSpec((1, C, N), lambda b, q: (b, 0, 0)),     # x
            pl.BlockSpec((C4 + C, C), lambda b, q: (0, 0)),      # [wq; wv] bf16
            pl.BlockSpec((C, 1), lambda b, q: (0, 0)),           # bv
            pl.BlockSpec((C, C), lambda b, q: (0, 0)),           # wt bf16
            pl.BlockSpec((C, 1), lambda b, q: (0, 0)),           # bt
        ],
        out_specs=(
            pl.BlockSpec((1, C, N), lambda b, q: (b, 0, 0)),     # t (bf16, pre-BN)
            pl.BlockSpec((1, C, 2), lambda b, q: (b, 0, 0)),     # packed BN stats
        ),
        out_shape=(
            jax.ShapeDtypeStruct((B, C, N), bf16),
            jax.ShapeDtypeStruct((B, C, 2), f32),
        ),
        scratch_shapes=[
            pltpu.VMEM((C4, N), bf16),      # qk projection (persists over q axis)
            pltpu.VMEM((C, N), f32),        # v projection
            pltpu.VMEM((CP, N), f32),       # [v@attn ; col-sum] accumulator
        ],
        compiler_params=pltpu.CompilerParams(
            dimension_semantics=("parallel", "arbitrary"),
            vmem_limit_bytes=vmem1),
    )(x, wqv_bf, bv, wt_bf, bt)

    # ------------------------------------------------------------------ phase 2
    def phase2_kernel(stats_ref, gamma_ref, beta_ref, x_ref, t_ref, o_ref):
        inv_count = 1.0 / float(B * N)
        # TODO(synk): running_mean / running_var buffer updates (training-mode
        # side effect with no forward output) are not reproduced.
        s = jnp.sum(stats_ref[...], axis=0)                     # (C, 2)
        mean = s[:, 0:1] * inv_count                            # (C, 1)
        ex2 = s[:, 1:2] * inv_count
        var = jnp.maximum(ex2 - mean * mean, 0.0)
        inv_std = jax.lax.rsqrt(var + 1e-5)
        scale = gamma_ref[...] * inv_std                        # fold BN to scale/shift
        shift = beta_ref[...] - scale * mean
        y = scale * t_ref[0].astype(f32) + shift                # (C, N)
        o_ref[0] = x_ref[0] + jnp.maximum(y, 0.0)

    est2 = 2 * (C * N * 4 + C * N * 2 + C * N * 4) + B * C * 2 * 4 + 4 * C * 4
    vmem2 = int(min(64 << 20, max(16 << 20, est2 * 2)))

    out = pl.pallas_call(
        phase2_kernel,
        grid=(B,),
        in_specs=[
            pl.BlockSpec((B, C, 2), lambda b: (0, 0, 0)),        # stats (resident)
            pl.BlockSpec((C, 1), lambda b: (0, 0)),              # gamma
            pl.BlockSpec((C, 1), lambda b: (0, 0)),              # beta
            pl.BlockSpec((1, C, N), lambda b: (b, 0, 0)),        # x (residual)
            pl.BlockSpec((1, C, N), lambda b: (b, 0, 0)),        # t (bf16)
        ],
        out_specs=pl.BlockSpec((1, C, N), lambda b: (b, 0, 0)),
        out_shape=jax.ShapeDtypeStruct((B, C, N), x.dtype),
        compiler_params=pltpu.CompilerParams(
            dimension_semantics=("parallel",),
            vmem_limit_bytes=vmem2),
    )(stats, gamma, beta, x, t_bf)

    return out


def sa_layer_ref(x, wq, wv, bv, wt, bt, gamma, beta):
    """Pure-JAX fp32 reference mirroring the PyTorch forward (training-mode BN)."""
    qk = jnp.einsum('oc,bcn->bon', wq, x)                       # shared q/k weight
    v = jnp.einsum('oc,bcn->bon', wv, x) + bv[None]
    energy = jnp.einsum('bcn,bcm->bnm', qk, qk)                 # x_q @ x_k
    attn = jax.nn.softmax(energy, axis=-1)
    attn = attn / (1e-9 + attn.sum(axis=1, keepdims=True))
    x_r = jnp.einsum('bcn,bnm->bcm', v, attn)
    t = jnp.einsum('oc,bcn->bon', wt, x - x_r) + bt[None]
    mean = t.mean(axis=(0, 2), keepdims=True)
    var = ((t - mean) ** 2).mean(axis=(0, 2), keepdims=True)
    y = gamma[None] * (t - mean) * jax.lax.rsqrt(var + 1e-5) + beta[None]
    return x + jnp.maximum(y, 0.0)


if __name__ == "__main__":
    B, C, N = 2, 64, 256
    C4 = C // 4

    key = jax.random.PRNGKey(0)
    ks = jax.random.split(key, 8)
    wq = jax.random.normal(ks[0], (C4, C), jnp.float32) * 0.05   # q_conv == k_conv
    wv = jax.random.normal(ks[1], (C, C), jnp.float32) * 0.1
    bv = jax.random.normal(ks[2], (C, 1), jnp.float32) * 0.1
    wt = jax.random.normal(ks[3], (C, C), jnp.float32) * 0.1
    bt = jax.random.normal(ks[4], (C, 1), jnp.float32) * 0.1
    gamma = 1.0 + 0.1 * jax.random.normal(ks[5], (C, 1), jnp.float32)
    beta = 0.1 * jax.random.normal(ks[6], (C, 1), jnp.float32)
    x = jax.random.normal(ks[7], (B, C, N), jnp.float32)

    # tq=128 -> two query blocks per batch: exercises the tiled accumulation path.
    out = sa_layer(x, wq, wv, bv, wt, bt, gamma, beta, tq=128)
    out = jax.block_until_ready(out)

    ref = sa_layer_ref(x, wq, wv, bv, wt, bt, gamma, beta)
    assert out.shape == (B, C, N)
    # bf16 MXU operands, bf16 inter-phase t, and an approx EUP reciprocal on the
    # column renorm; compare against the all-fp32 reference accordingly.
    assert jnp.allclose(out, ref, atol=5e-2, rtol=5e-2), "mismatch vs reference"

    print("KERNEL_OK")
</pallas_src>

<mosaic_0001>
module attributes {stable_mosaic.version = 11 : i64} {
  func.func @phase1_kernel(%arg0: i32, %arg1: i32, %arg2: memref<1x64x256xf32, #tpu.memory_space<vmem>>, %arg3: memref<80x64xbf16, #tpu.memory_space<vmem>>, %arg4: memref<64x1xf32, #tpu.memory_space<vmem>>, %arg5: memref<64x64xbf16, #tpu.memory_space<vmem>>, %arg6: memref<64x1xf32, #tpu.memory_space<vmem>>, %arg7: memref<1x64x256xbf16, #tpu.memory_space<vmem>>, %arg8: memref<1x64x2xf32, #tpu.memory_space<vmem>>, %arg9: memref<16x256xbf16, #tpu.memory_space<vmem>>, %arg10: memref<64x256xf32, #tpu.memory_space<vmem>>, %arg11: memref<80x256xf32, #tpu.memory_space<vmem>>) attributes {dimension_semantics = [#tpu.dimension_semantics<parallel>, #tpu.dimension_semantics<arbitrary>], iteration_bounds = array<i64: 2, 2>, scalar_prefetch = 0 : i64, scratch_operands = 3 : i64, tpu.core_type = #tpu.core_type<tc>, window_params = [{transform_indices = @transform_0, window_bounds = array<i64: 1, 64, 256>}, {pipeline_mode = #tpu.pipeline_mode<synchronous>, transform_indices = @transform_1, window_bounds = array<i64: 80, 64>}, {pipeline_mode = #tpu.pipeline_mode<synchronous>, transform_indices = @transform_2, window_bounds = array<i64: 64, 1>}, {pipeline_mode = #tpu.pipeline_mode<synchronous>, transform_indices = @transform_3, window_bounds = array<i64: 64, 64>}, {pipeline_mode = #tpu.pipeline_mode<synchronous>, transform_indices = @transform_4, window_bounds = array<i64: 64, 1>}, {transform_indices = @transform_5, window_bounds = array<i64: 1, 64, 256>}, {transform_indices = @transform_6, window_bounds = array<i64: 1, 64, 2>}]} {
    %c0_i32 = arith.constant 0 : i32
    %0 = arith.cmpi eq, %arg1, %c0_i32 : i32
    %1 = arith.extui %0 : i1 to i32
    %c0_i32_0 = arith.constant 0 : i32
    %2 = arith.cmpi ne, %1, %c0_i32_0 : i32
    scf.if %2 {
      %c0_13 = arith.constant 0 : index
      %c0_14 = arith.constant 0 : index
      %c0_15 = arith.constant 0 : index
      %32 = vector.load %arg2[%c0_13, %c0_14, %c0_15] : memref<1x64x256xf32, #tpu.memory_space<vmem>>, vector<1x64x256xf32>
      %33 = vector.shape_cast %32 : vector<1x64x256xf32> to vector<64x256xf32>
      %34 = arith.truncf %33 : vector<64x256xf32> to vector<64x256xbf16>
      %c0_16 = arith.constant 0 : index
      %c0_17 = arith.constant 0 : index
      %35 = vector.load %arg3[%c0_16, %c0_17] : memref<80x64xbf16, #tpu.memory_space<vmem>>, vector<80x64xbf16>
      %cst_18 = arith.constant dense<0.000000e+00> : vector<80x256xf32>
      %36 = tpu.matmul %35, %34, %cst_18 {dimension_numbers = #tpu.dot_dimension_numbers<[1], [0], [0], [1], [0, 0, 1, 1], [], []>} : vector<80x64xbf16>, vector<64x256xbf16>, vector<80x256xf32> -> vector<80x256xf32>
      %37 = vector.extract_strided_slice %36 {offsets = [0, 0], sizes = [16, 256], strides = [1, 1]} : vector<80x256xf32> to vector<16x256xf32>
      %38 = arith.truncf %37 : vector<16x256xf32> to vector<16x256xbf16>
      %c0_19 = arith.constant 0 : index
      %c0_20 = arith.constant 0 : index
      %39 = vector.load %arg9[%c0_19, %c0_20] : memref<16x256xbf16, #tpu.memory_space<vmem>>, vector<16x256xbf16>
      tpu.vector_store %arg9[%c0_19, %c0_20], %38 {strides = array<i32>} : memref<16x256xbf16, #tpu.memory_space<vmem>>, vector<16x256xbf16>,
      %40 = vector.extract_strided_slice %36 {offsets = [16, 0], sizes = [64, 256], strides = [1, 1]} : vector<80x256xf32> to vector<64x256xf32>
      %c0_21 = arith.constant 0 : index
      %c0_22 = arith.constant 0 : index
      %41 = vector.load %arg4[%c0_21, %c0_22] : memref<64x1xf32, #tpu.memory_space<vmem>>, vector<64x1xf32>
      %42 = vector.broadcast %41 : vector<64x1xf32> to vector<64x256xf32>
      %43 = arith.addf %40, %42 : vector<64x256xf32>
      %c0_23 = arith.constant 0 : index
      %c0_24 = arith.constant 0 : index
      %44 = vector.load %arg10[%c0_23, %c0_24] : memref<64x256xf32, #tpu.memory_space<vmem>>, vector<64x256xf32>
      tpu.vector_store %arg10[%c0_23, %c0_24], %43 {strides = array<i32>} : memref<64x256xf32, #tpu.memory_space<vmem>>, vector<64x256xf32>,
      %cst_25 = arith.constant 0.000000e+00 : f32
      %45 = vector.broadcast %cst_25 : f32 to vector<80x256xf32>
      %c0_26 = arith.constant 0 : index
      %c0_27 = arith.constant 0 : index
      %46 = vector.load %arg11[%c0_26, %c0_27] : memref<80x256xf32, #tpu.memory_space<vmem>>, vector<80x256xf32>
      tpu.vector_store %arg11[%c0_26, %c0_27], %45 {strides = array<i32>} : memref<80x256xf32, #tpu.memory_space<vmem>>, vector<80x256xf32>,
    } else {
    }
    %c128_i32 = arith.constant 128 : i32
    %3 = arith.muli %arg1, %c128_i32 : i32
    %4 = tpu.assume_multiple %3, 128 : i32
    %c0 = arith.constant 0 : index
    %5 = arith.index_cast %4 : i32 to index
    %6 = vector.load %arg9[%c0, %5] : memref<16x256xbf16, #tpu.memory_space<vmem>>, vector<16x128xbf16>
    %c0_1 = arith.constant 0 : index
    %c0_2 = arith.constant 0 : index
    %7 = vector.load %arg9[%c0_1, %c0_2] : memref<16x256xbf16, #tpu.memory_space<vmem>>, vector<16x256xbf16>
    %cst = arith.constant dense<0.000000e+00> : vector<256x128xf32>
    %8 = tpu.matmul %7, %6, %cst {dimension_numbers = #tpu.dot_dimension_numbers<[0], [0], [1], [1], [0, 1, 1, 1], [], []>} : vector<16x256xbf16>, vector<16x128xbf16>, vector<256x128xf32> -> vector<256x128xf32>
    %cst_3 = arith.constant dense<0xFF800000> : vector<128xf32>
    %9 = vector.multi_reduction <maximumf>, %8, %cst_3 [0] : vector<256x128xf32> to vector<128xf32>
    %10 = vector.shape_cast %9 : vector<128xf32> to vector<1x128xf32>
    %11 = vector.broadcast %10 : vector<1x128xf32> to vector<256x128xf32>
    %12 = arith.subf %8, %11 : vector<256x128xf32>
    %13 = math.exp %12 : vector<256x128xf32>
    %cst_4 = arith.constant dense<0.000000e+00> : vector<128xf32>
    %14 = vector.multi_reduction <add>, %13, %cst_4 [0] : vector<256x128xf32> to vector<128xf32>
    %15 = vector.shape_cast %14 : vector<128xf32> to vector<1x128xf32>
    %16 = tpu.reciprocal %15 : vector<1x128xf32> -> vector<1x128xf32>
    %c0_5 = arith.constant 0 : index
    %17 = arith.index_cast %4 : i32 to index
    %18 = vector.load %arg10[%c0_5, %17] : memref<64x256xf32, #tpu.memory_space<vmem>>, vector<64x128xf32>
    %19 = vector.broadcast %16 : vector<1x128xf32> to vector<64x128xf32>
    %20 = arith.mulf %18, %19 : vector<64x128xf32>
    %cst_6 = arith.constant 0.000000e+00 : f32
    %21 = vector.broadcast %cst_6 : f32 to vector<15x128xf32>
    %22 = tpu.concatenate %20, %16, %21 in 0 : vector<64x128xf32>, vector<1x128xf32>, vector<15x128xf32> -> vector<80x128xf32>
    %23 = arith.truncf %22 : vector<80x128xf32> to vector<80x128xbf16>
    %c0_7 = arith.constant 0 : index
    %c0_8 = arith.constant 0 : index
    %24 = vector.load %arg11[%c0_7, %c0_8] : memref<80x256xf32, #tpu.memory_space<vmem>>, vector<80x256xf32>
    %25 = arith.truncf %13 : vector<256x128xf32> to vector<256x128xbf16>
    %cst_9 = arith.constant dense<0.000000e+00> : vector<80x256xf32>
    %26 = tpu.matmul %23, %25, %cst_9 {dimension_numbers = #tpu.dot_dimension_numbers<[1], [1], [0], [0], [0, 0, 1, 0], [], []>} : vector<80x128xbf16>, vector<256x128xbf16>, vector<80x256xf32> -> vector<80x256xf32>
    %27 = arith.addf %24, %26 : vector<80x256xf32>
    %c0_10 = arith.constant 0 : index
    %c0_11 = arith.constant 0 : index
    %28 = vector.load %arg11[%c0_10, %c0_11] : memref<80x256xf32, #tpu.memory_space<vmem>>, vector<80x256xf32>
    tpu.vector_store %arg11[%c0_10, %c0_11], %27 {strides = array<i32>} : memref<80x256xf32, #tpu.memory_space<vmem>>, vector<80x256xf32>,
    %c1_i32 = arith.constant 1 : i32
    %29 = arith.cmpi eq, %arg1, %c1_i32 : i32
    %30 = arith.extui %29 : i1 to i32
    %c0_i32_12 = arith.constant 0 : i32
    %31 = arith.cmpi ne, %30, %c0_i32_12 : i32
    scf.if %31 {
      %c64 = arith.constant 64 : index
      %c0_13 = arith.constant 0 : index
      %32 = vector.load %arg11[%c64, %c0_13] : memref<80x256xf32, #tpu.memory_space<vmem>>, vector<1x256xf32>
      %cst_14 = arith.constant 9.99999971E-10 : f32
      %33 = vector.broadcast %cst_14 : f32 to vector<1x256xf32>
      %34 = arith.addf %32, %33 : vector<1x256xf32>
      %35 = tpu.reciprocal %34 {approx = true} : vector<1x256xf32> -> vector<1x256xf32>
      %c0_15 = arith.constant 0 : index
      %c0_16 = arith.constant 0 : index
      %36 = vector.load %arg11[%c0_15, %c0_16] : memref<80x256xf32, #tpu.memory_space<vmem>>, vector<64x256xf32>
      %37 = vector.broadcast %35 : vector<1x256xf32> to vector<64x256xf32>
      %38 = arith.mulf %36, %37 : vector<64x256xf32>
      %c0_17 = arith.constant 0 : index
      %c0_18 = arith.constant 0 : index
      %c0_19 = arith.constant 0 : index
      %39 = vector.load %arg2[%c0_17, %c0_18, %c0_19] : memref<1x64x256xf32, #tpu.memory_space<vmem>>, vector<1x64x256xf32>
      %40 = vector.shape_cast %39 : vector<1x64x256xf32> to vector<64x256xf32>
      %41 = arith.subf %40, %38 : vector<64x256xf32>
      %42 = arith.truncf %41 : vector<64x256xf32> to vector<64x256xbf16>
      %c0_20 = arith.constant 0 : index
      %c0_21 = arith.constant 0 : index
      %43 = vector.load %arg5[%c0_20, %c0_21] : memref<64x64xbf16, #tpu.memory_space<vmem>>, vector<64x64xbf16>
      %cst_22 = arith.constant dense<0.000000e+00> : vector<64x256xf32>
      %44 = tpu.matmul %43, %42, %cst_22 {dimension_numbers = #tpu.dot_dimension_numbers<[1], [0], [0], [1], [0, 0, 1, 1], [], []>} : vector<64x64xbf16>, vector<64x256xbf16>, vector<64x256xf32> -> vector<64x256xf32>
      %c0_23 = arith.constant 0 : index
      %c0_24 = arith.constant 0 : index
      %45 = vector.load %arg6[%c0_23, %c0_24] : memref<64x1xf32, #tpu.memory_space<vmem>>, vector<64x1xf32>
      %46 = vector.broadcast %45 : vector<64x1xf32> to vector<64x256xf32>
      %47 = arith.addf %44, %46 : vector<64x256xf32>
      %48 = arith.truncf %47 : vector<64x256xf32> to vector<64x256xbf16>
      %c0_25 = arith.constant 0 : index
      %c0_26 = arith.constant 0 : index
      %c0_27 = arith.constant 0 : index
      %49 = vector.load %arg7[%c0_25, %c0_26, %c0_27] : memref<1x64x256xbf16, #tpu.memory_space<vmem>>, vector<1x64x256xbf16>
      %50 = vector.shape_cast %49 : vector<1x64x256xbf16> to vector<64x256xbf16>
      %51 = vector.shape_cast %48 : vector<64x256xbf16> to vector<1x64x256xbf16>
      tpu.vector_store %arg7[%c0_25, %c0_26, %c0_27], %51 {strides = array<i32>} : memref<1x64x256xbf16, #tpu.memory_space<vmem>>, vector<1x64x256xbf16>,
      %cst_28 = arith.constant dense<0.000000e+00> : vector<64xf32>
      %52 = vector.multi_reduction <add>, %47, %cst_28 [1] : vector<64x256xf32> to vector<64xf32>
      %53 = vector.shape_cast %52 : vector<64xf32> to vector<64x1xf32>
      %54 = arith.mulf %47, %47 : vector<64x256xf32>
      %cst_29 = arith.constant dense<0.000000e+00> : vector<64xf32>
      %55 = vector.multi_reduction <add>, %54, %cst_29 [1] : vector<64x256xf32> to vector<64xf32>
      %56 = vector.shape_cast %55 : vector<64xf32> to vector<64x1xf32>
      %57 = tpu.concatenate %53, %56 in 1 : vector<64x1xf32>, vector<64x1xf32> -> vector<64x2xf32>
      %c0_30 = arith.constant 0 : index
      %c0_31 = arith.constant 0 : index
      %c0_32 = arith.constant 0 : index
      %58 = vector.load %arg8[%c0_30, %c0_31, %c0_32] : memref<1x64x2xf32, #tpu.memory_space<vmem>>, vector<1x64x2xf32>
      %59 = vector.shape_cast %58 : vector<1x64x2xf32> to vector<64x2xf32>
      %60 = vector.shape_cast %57 : vector<64x2xf32> to vector<1x64x2xf32>
      tpu.vector_store %arg8[%c0_30, %c0_31, %c0_32], %60 {strides = array<i32>} : memref<1x64x2xf32, #tpu.memory_space<vmem>>, vector<1x64x2xf32>,
    } else {
    }
    return
  }
  func.func @transform_0(%arg0: i32, %arg1: i32) -> (i32, i32, i32) {
    %c0_i32 = arith.constant 0 : i32
    %c0_i32_0 = arith.constant 0 : i32
    %c0_i32_1 = arith.constant 0 : i32
    return %arg0, %c0_i32, %c0_i32_0 : i32, i32, i32
  }
  func.func @transform_1(%arg0: i32, %arg1: i32) -> (i32, i32) {
    %c0_i32 = arith.constant 0 : i32
    %c0_i32_0 = arith.constant 0 : i32
    %c0_i32_1 = arith.constant 0 : i32
    return %c0_i32, %c0_i32_0 : i32, i32
  }
  func.func @transform_2(%arg0: i32, %arg1: i32) -> (i32, i32) {
    %c0_i32 = arith.constant 0 : i32
    %c0_i32_0 = arith.constant 0 : i32
    %c0_i32_1 = arith.constant 0 : i32
    return %c0_i32, %c0_i32_0 : i32, i32
  }
  func.func @transform_3(%arg0: i32, %arg1: i32) -> (i32, i32) {
    %c0_i32 = arith.constant 0 : i32
    %c0_i32_0 = arith.constant 0 : i32
    %c0_i32_1 = arith.constant 0 : i32
    return %c0_i32, %c0_i32_0 : i32, i32
  }
  func.func @transform_4(%arg0: i32, %arg1: i32) -> (i32, i32) {
    %c0_i32 = arith.constant 0 : i32
    %c0_i32_0 = arith.constant 0 : i32
    %c0_i32_1 = arith.constant 0 : i32
    return %c0_i32, %c0_i32_0 : i32, i32
  }
  func.func @transform_5(%arg0: i32, %arg1: i32) -> (i32, i32, i32) {
    %c0_i32 = arith.constant 0 : i32
    %c0_i32_0 = arith.constant 0 : i32
    %c0_i32_1 = arith.constant 0 : i32
    return %arg0, %c0_i32, %c0_i32_0 : i32, i32, i32
  }
  func.func @transform_6(%arg0: i32, %arg1: i32) -> (i32, i32, i32) {
    %c0_i32 = arith.constant 0 : i32
    %c0_i32_0 = arith.constant 0 : i32
    %c0_i32_1 = arith.constant 0 : i32
    return %arg0, %c0_i32, %c0_i32_0 : i32, i32, i32
  }
}

</mosaic_0001>

<bundles_post_ra>
// kernel: tpu_custom_call.1
= control target key start
LH: loop header
LB: loop body
LE: loop exit
PB: predicated region body
PF: predicated region fallthrough
CT: control target
= control target key end

     0   :  { %12 = vsyncpa [#allocation6], 0  ;;  %s2865_s0 = inlined_call_operand.hbm [shape: f32[2,64,256], index: 0, kind: input, shape index: {}]   ;;  %s2866_s1 = inlined_call_operand.vmem [shape: bf16[80,64], index: 1, kind: input, shape index: {}]   ;;  %s2867_s2 = inlined_call_operand.vmem [shape: f32[64,1], index: 2, kind: input, shape index: {}]   ;;  %s2868_s3 = inlined_call_operand.vmem [shape: bf16[64,64], index: 3, kind: input, shape index: {}]   ;;  %s2869_s4 = inlined_call_operand.vmem [shape: f32[64,1], index: 4, kind: input, shape index: {}]   ;;  %s2870_s5 = inlined_call_operand.hbm [shape: bf16[2,64,256], index: 5, kind: output, shape index: {0}]   ;;  %s2871_s6 = inlined_call_operand.vmem [shape: f32[2,64,2], index: 6, kind: output, shape index: {1}]  }
   0x1   :  { %14 = vsyncpa [#allocation6 + $0x1], 0 }
   0x2   :  { %15 = vsyncpa [#allocation7], 0 }
   0x3   :  { %17 = vsyncpa [#allocation7 + $0x1], 0  ;;  %s2225_s21 = smov 0   ;;  %s2227_s22 = smov 0  }
   0x4   :  { %s2229_s23 = smov 0   ;;  %s2231_s24 = smov 0  }
   0x5   :  { %s2233_s25 = smov 0   ;;  %s2235_s26 = smov 0  }
   0x6   :  { %s2237_s27 = smov 0   ;;  %s2239_s28 = smov 0  }
   0x7 LB: > { %s1693_s29 = sadd.s32 4294967295, %s2177_s28   ;;  %s1694_s30 = sadd.s32 4294967294, %s2177_s28   ;;  %s2177_s28 = sphi %s2239_s28, %s23_s28   ;;  %s2173_s27 = sphi %s2237_s27, %s2890_s27   ;;  %s2169_s26 = sphi %s2235_s26, %s2889_s26   ;;  %s2165_s25 = sphi %s2233_s25, %s2888_s25   ;;  %s2161_s24 = sphi %s2231_s24, %s2887_s24   ;;  %s2157_s23 = sphi %s2229_s23, %s2886_s23   ;;  %s2153_s22 = sphi %s2227_s22, %s2885_s22   ;;  %s2149_s21 = sphi %s2225_s21, %s2884_s21  }
   0x8   : > { %s32_s7 = sadd.s32 1, %s2169_s26  ;;  %s35_s8 = sadd.s32 1, %s2173_s27 }
   0x9   : > { %p33_p0 = scmp.ge.s32.totalorder %s32_s7, 2  ;;  %s42_s9 = sadd.s32 1, %s2157_s23 }
   0xa   : > { %p49_p1 = scmp.ne.s32.totalorder %s2157_s23, %s2153_s22  ;;  %p50_p2 = scmp.eq.s32.totalorder %s2177_s28, 0 }
   0xb   : > { %s2892_s7 = smov (%p33_p0, %s32_s7), 0  ;;  %s2894_s8 = smov (!%p33_p0, %s35_s8), %s2173_s27 }
   0xc   : > { %p2276_p3 = por %p50_p2, %p49_p1  ;;  %p55_p4 = scmp.ne.s32.totalorder %s2153_s22, %s2149_s21 }
   0xd   : > { %p37_p5 = scmp.ge.s32.totalorder %s2894_s8, 2  ;;  %p56_p6 = scmp.eq.s32.totalorder %s1693_s29, 0 }
   0xe   : > { %p163_p7 = scmp.eq.s32.totalorder %s1693_s29, 3  ;;  %p169_p8 = scmp.eq.s32.totalorder %s1694_s30, 3 }
   0xf   : > { %s2896_s8 = smov (%p37_p5, %s2894_s8), 0  ;;  %p2284_p9 = por %p56_p6, %p55_p4 }
  0x10   : > { %2875 = sst [smem:[#allocation11_spill]] %s2896_s8  ;;  %p2288_p10 = por %p163_p7, %p49_p1 }
  0x11   : > { %s39_s13 = ssub.s32 %s2173_s27, %s2896_s8  ;;  %p2294_p11 = por %p169_p8, %p55_p4 }
  0x12   : > { %s2877_s12 = scalar_select %p2288_p10, 1, 0 }
  0x13   : > { %s2878_s14 = scalar_select %p2294_p11, 1, 0 }
  0x14   : > { %p40_p12 = scmp.eq.s32.totalorder %s39_s13, 0  ;;  %p1892_p13 = scmp.lt.s32.totalorder %s2177_s28, 4 }
  0x15   : > { %s227_s15 = sand.u32 1, %s2157_s23   ;;  %s1760_s18 = sshll.u32 %s2173_s27, 11 }
  0x16   : > { %s2301_s16 = scalar_select %p40_p12, %s2157_s23, %s42_s9  }
  0x17   : > { %s1697_s17 = sshll.u32 %s227_s15, 7  ;;  %s2307_s29 = scalar_lea.hbm %s2865_s0, %s1760_s18 }
  0x18   : > { %s231_s30 = scalar_lea.vmem [#allocation5], %s1697_s17  ;;  %p2313_p0 = pnand %p1892_p13, %p2276_p3 }
  0x19   : > { %s238_s8 = sshll.u32 %s231_s30, 4  ;;  %s2318_s9 = scalar_lea.sflag [#allocation6], %s227_s15  ;;  %s2309_s8 = int_to_ptr.vmem [resolvable:$true] %s238_s8 }
  0x1a   : > { %s2049_s18 = scalar_lea.hbm %s2307_s29, 2048  ;;  %p2051_p4 = pneg %p2313_p0 }
  0x1b   : > { %p2050_p2 = scmp.ne.s32.totalorder %s2307_s29, %s2049_s18  ;;  %s2054_s10 = scalar_lea.hbm %s2865_s0, 4096 }
  0x1c   : > { %p2055_p3 = scmp.lt.u32.totalorder %s2307_s29, %s2865_s0  ;;  %p2056_p7 = scmp.lt.u32.totalorder %s2054_s10, %s2049_s18 }
  0x1d   : > { %p2052_p5 = pnand %p2051_p4, %p2050_p2  ;;  %p2058_p12 = scmp.lt.u32.totalorder %s2049_s18, %s2307_s29 }
  0x1e   : > { %p2057_p8 = por %p2056_p7, %p2055_p3 }
  0x1f   : > { %p2053_p6 = pneg %p2052_p5 }
  0x20   : > { %p2059_p13 = por %p2058_p12, %p2057_p8 }
  0x22   : > { %p2060_p1 = pnand %p2059_p13, %p2053_p6 }
  0x24   : > { %2063 = shalt.err (!%p2060_p1)
}
  0x25   : > { %s2064_s15 = scalar_lea.vmem %s2309_s8, 2048  ;;  %s2179_s17 = smov [#allocation5]  }
  0x26   : > { %p2065_p2 = scmp.ne.s32.totalorder %s2309_s8, %s2064_s15  ;;  %s2069_s19 = sshll.u32 %s2179_s17, 4  ;;  %s2070_s19 = int_to_ptr.vmem [resolvable:$false] %s2069_s19 }
  0x27   : > { %s2071_s20 = scalar_lea.vmem %s2070_s19, 4096  ;;  %p2072_p10 = scmp.lt.s32.totalorder %s2309_s8, %s2070_s19 }
  0x28   : > { %p2067_p5 = pnand %p2065_p2, %p2051_p4  ;;  %p2073_p3 = scmp.lt.s32.totalorder %s2071_s20, %s2064_s15 }
  0x2a   : > { %p2068_p11 = pneg %p2067_p5  ;;  %p2074_p7 = por %p2073_p3, %p2072_p10 }
  0x2c   : > { %p2075_p8 = pnand %p2074_p7, %p2068_p11 }
  0x2e   : > { %2078 = shalt.err (!%p2075_p8)
}
  0x2f   : > { %s2180_s18 = smov 256   ;;  %s2181_s10 = smov 16  }
  0x30   : > { %1887 = dma.hbm_to_vmem [thread:$0]  (!%p2313_p0), %s2307_s29, 2048, %s2309_s8, %s2318_s9, %s2180_s18, %s2180_s18, %s2181_s10  }
  0x31   : > { %p246_p1 = scmp.lt.s32.totalorder %s2177_s28, 5  ;;  %p2880_p4 = scmp.ge.s32.totalorder %s2177_s28, 1 }
  0x33   : > { %p247_p6 = pnand %p2880_p4, %p246_p1 }
  0x34   : > { %s2350_s30 = sand.u32 (!%p247_p6), 1, %s2153_s22  }
  0x35   : > { %250 = sbr.rel (%p247_p6) target bundleno = 1522 (0x5f2), region = 40  ;;  %s1701_s15 = sshll.u32 (!%p247_p6), %s2350_s30, 7 }
  0x36   : > { %s253_s17 = scalar_lea.sflag (!%p247_p6), [#allocation6], %s2350_s30  ;;  %s2354_s19 = scalar_lea.vmem (!%p247_p6), [#allocation5], %s1701_s15 }
  0x3c   : > { %2140 = dma.done.wait (%p2284_p9), %s253_s17, 2048  }
  0x3d   : > { %2142 = vsyncadd (%p2284_p9), %s253_s17, 4294965248  ;;  %s1702_s8 = sshll.u32 %s2350_s30, 6  ;;  %p290_p10 = scmp.lt.s32.totalorder %s2165_s25, 1 }
  0x3e   : > { %s2368_s10 = scalar_lea.vmem [#allocation8], %s1702_s8  ;;  %p1705_p11 = scmp.ne.s32.totalorder %s2161_s24, 0 }
  0x3f   : > { %s291_s29 = scalar_select %p290_p10, %s2165_s25, 1 }
  0x40   : > { %299 = sbr.rel (%p1705_p11) target bundleno = 317 (0x13d), region = 48  ;;  %v301_v0 = vld [vmem:[%s2354_s19 + $0x8] sm:$0xff] (!%p1705_p11)  ;;  %v303_v1 = vld [vmem:[%s2354_s19 + $0x18] sm:$0xff] (!%p1705_p11)  ;;  %v300_v2 = vld [vmem:[%s2354_s19] sm:$0xff] (!%p1705_p11)  ;;  %v2182_v7 = vmov (!%p1705_p11), 0   ;;  %vm359_vm0 = vcmask (!%p1705_p11), 523264  }
  0x41   : > { %s1761_s13 = sshll.u32 %s291_s29, 6  ;;  %v317_v3 = vpack.c.bf16 (!%p1705_p11), %v303_v1, %v301_v0  ;;  %v302_v4 = vld [vmem:[%s2354_s19 + $0x10] sm:$0xff] (!%p1705_p11)  ;;  %v305_v5 = vld [vmem:[%s2354_s19 + $0x28] sm:$0xff] (!%p1705_p11)  ;;  %v307_v6 = vld [vmem:[%s2354_s19 + $0x38] sm:$0xff] (!%p1705_p11)  ;;  %407 = vmatprep.mubr.bf16.mxu0 (!%p1705_p11), %v2182_v7  ;;  %437 = vmatprep.mubr.bf16.mxu1 (!%p1705_p11), %v2182_v7  ;;  %v2183_v38 = vmov (!%p1705_p11), 0.0  }
  0x42   : > { %s2366_s18 = scalar_lea.vmem %s2871_s6, %s1761_s13  ;;  %v316_v8 = vpack.c.bf16 (!%p1705_p11), %v302_v4, %v300_v2  ;;  %v319_v9 = vpack.c.bf16 (!%p1705_p11), %v307_v6, %v305_v5  ;;  %v304_v10 = vld [vmem:[%s2354_s19 + $0x20] sm:$0xff] (!%p1705_p11)  ;;  %v306_v11 = vld [vmem:[%s2354_s19 + $0x30] sm:$0xff] (!%p1705_p11)  ;;  %v309_v12 = vld [vmem:[%s2354_s19 + $0x48] sm:$0xff] (!%p1705_p11)  ;;  %1969 = vset.pattern.permute.xlu1 (!%p1705_p11), %v2182_v7  ;;  %1968 = vset.pattern.permute.xlu0 (!%p1705_p11), %v2182_v7  ;;  %542 = vst [vmem:[#allocation4] sm:$0xff] (!%p1705_p11), %v2183_v38 }
  0x43   : > { %375 = vmatprep.subr.bf16.mxu0 (!%p1705_p11), %v317_v3  ;;  %1848 = vmatprep.subr.bf16.mxu1 (!%p1705_p11), %v317_v3  ;;  %v311_v13 = vld [vmem:[%s2354_s19 + $0x58] sm:$0xff] (!%p1705_p11)  ;;  %v318_v14 = vpack.c.bf16 (!%p1705_p11), %v306_v11, %v304_v10  ;;  %v308_v15 = vld [vmem:[%s2354_s19 + $0x40] sm:$0xff] (!%p1705_p11)  ;;  %v310_v16 = vld [vmem:[%s2354_s19 + $0x50] sm:$0xff] (!%p1705_p11)  ;;  %543 = vst [vmem:[#allocation4 + $0x8] sm:$0xff] (!%p1705_p11), %v2183_v38 }
  0x44   : > { %376 = vmatpush1.bf16.msra.mxu0 (!%p1705_p11), %v316_v8  ;;  %1852 = vmatpush1.bf16.msra.mxu1 (!%p1705_p11), %v316_v8  ;;  %v321_v17 = vpack.c.bf16 (!%p1705_p11), %v311_v13, %v309_v12  ;;  %v313_v18 = vld [vmem:[%s2354_s19 + $0x68] sm:$0xff] (!%p1705_p11)  ;;  %v315_v19 = vld [vmem:[%s2354_s19 + $0x78] sm:$0xff] (!%p1705_p11)  ;;  %v320_v20 = vpack.c.bf16 (!%p1705_p11), %v310_v16, %v308_v15  ;;  %v312_v21 = vld [vmem:[%s2354_s19 + $0x60] sm:$0xff] (!%p1705_p11)  ;;  %544 = vst [vmem:[#allocation4 + $0x10] sm:$0xff] (!%p1705_p11), %v2183_v38 }
  0x45   : > { %377 = vmatprep.subr.bf16.mxu0 (!%p1705_p11), %v319_v9  ;;  %1849 = vmatprep.subr.bf16.mxu1 (!%p1705_p11), %v319_v9  ;;  %v323_v22 = vpack.c.bf16 (!%p1705_p11), %v315_v19, %v313_v18  ;;  %v314_v23 = vld [vmem:[%s2354_s19 + $0x70] sm:$0xff] (!%p1705_p11)  ;;  %v464_v24 = vld [vmem:[%s2867_s2 + $0x10] sm:$0xff] (!%p1705_p11)  ;;  %v465_v27 = vld [vmem:[%s2867_s2 + $0x18] sm:$0xff] (!%p1705_p11)  ;;  %545 = vst [vmem:[#allocation4 + $0x18] sm:$0xff] (!%p1705_p11), %v2183_v38 }
  0x46   : > { %v462_v25 = vld [vmem:[%s2867_s2] sm:$0xff] (!%p1705_p11)  ;;  %482 = vperm.xlu1 (!%p1705_p11), %1969, %v464_v24   ;;  %v322_v26 = vpack.c.bf16 (!%p1705_p11), %v314_v23, %v312_v21  ;;  %v463_v28 = vld [vmem:[%s2867_s2 + $0x8] sm:$0xff] (!%p1705_p11)  ;;  %v1971_v30 = vld [vmem:[%s2866_s1 + $0x18] sm:$0xff] (!%p1705_p11)   ;;  %546 = vst [vmem:[#allocation4 + $0x20] sm:$0xff] (!%p1705_p11), %v2183_v38 }
  0x47   : > { %472 = vperm.xlu0 %1968, %v462_v25   ;;  %v1970_v29 = vld [vmem:[%s2866_s1] sm:$0xff]   ;;  %v467_v31 = vld [vmem:[%s2867_s2 + $0x28] sm:$0xff]  ;;  %v469_v33 = vld [vmem:[%s2867_s2 + $0x38] sm:$0xff]  ;;  %547 = vst [vmem:[#allocation4 + $0x28] sm:$0xff] %v2183_v38 }
  0x48   : > { %378 = vmatpush1.bf16.msra.mxu0 %v318_v14  ;;  %1853 = vmatpush1.bf16.msra.mxu1 %v318_v14  ;;  %v466_v32 = vld [vmem:[%s2867_s2 + $0x20] sm:$0xff]  ;;  %v468_v34 = vld [vmem:[%s2867_s2 + $0x30] sm:$0xff]  ;;  %v1972_v35 = vld [vmem:[%s2866_s1 + $0x8] sm:$0xff]   ;;  %548 = vst [vmem:[#allocation4 + $0x30] sm:$0xff] %v2183_v38 }
  0x49   : > { %379 = vmatprep.subr.bf16.mxu0 %v321_v17  ;;  %1850 = vmatprep.subr.bf16.mxu1 %v321_v17  ;;  %v1973_v36 = vld [vmem:[%s2866_s1 + $0x20] sm:$0xff]   ;;  %v1974_v37 = vld [vmem:[%s2866_s1 + $0x10] sm:$0xff]   ;;  %549 = vst [vmem:[#allocation4 + $0x38] sm:$0xff] %v2183_v38  ;;  %550 = vst [vmem:[#allocation4 + $0x40] sm:$0xff] %v2183_v38 }
  0x4a   : > { %487 = vperm.xlu1 %1969, %v465_v27   ;;  %551 = vst [vmem:[#allocation4 + $0x48] sm:$0xff] %v2183_v38  ;;  %552 = vst [vmem:[#allocation4 + $0x50] sm:$0xff] %v2183_v38 }
  0x4b   : > { %477 = vperm.xlu0 %1968, %v463_v28   ;;  %553 = vst [vmem:[#allocation4 + $0x58] sm:$0xff] %v2183_v38  ;;  %554 = vst [vmem:[#allocation4 + $0x60] sm:$0xff] %v2183_v38 }
  0x4c   : > { %380 = vmatpush1.bf16.msra.mxu0 %v320_v20  ;;  %1854 = vmatpush1.bf16.msra.mxu1 %v320_v20  ;;  %555 = vst [vmem:[#allocation4 + $0x68] sm:$0xff] %v2183_v38  ;;  %556 = vst [vmem:[#allocation4 + $0x70] sm:$0xff] %v2183_v38 }
  0x4d   : > { %381 = vmatprep.subr.bf16.mxu0 %v323_v22  ;;  %1851 = vmatprep.subr.bf16.mxu1 %v323_v22  ;;  %557 = vst [vmem:[#allocation4 + $0x78] sm:$0xff] %v2183_v38  ;;  %558 = vst [vmem:[#allocation4 + $0x80] sm:$0xff] %v2183_v38 }
  0x4e   : > { %497 = vperm.xlu1 %1969, %v467_v31   ;;  %559 = vst [vmem:[#allocation4 + $0x88] sm:$0xff] %v2183_v38  ;;  %560 = vst [vmem:[#allocation4 + $0x90] sm:$0xff] %v2183_v38 }
  0x4f   : > { %492 = vperm.xlu0 %1968, %v466_v32   ;;  %561 = vst [vmem:[#allocation4 + $0x98] sm:$0xff] %v2183_v38 }
  0x50   : > { %382 = vmatpush1.bf16.msra.mxu0 %v322_v26  ;;  %1855 = vmatpush1.bf16.msra.mxu1 %v322_v26 }
  0x52   : > { %507 = vperm.xlu1 %1969, %v469_v33  }
  0x53   : > { %1711 = vmatmul.mubr.msk.bf16.vlgmr.msra.gmra.mrb[0].mxu0 %vm359_vm0, %v1970_v29  ;;  %1714 = vmatmul.mubr.msk.bf16.vlgmr.msra.gmra.mrb[0].mxu1 %vm359_vm0, %v1971_v30 }
  0x54   : > { %417 = vmatprep.mubr.bf16.mxu0 %v2182_v7  ;;  %447 = vmatprep.mubr.bf16.mxu1 %v2182_v7 }
  0x55   : > { %502 = vperm.xlu0 %1968, %v468_v34  }
  0x5b   : > { %1712 = vmatmul.mubr.msk.bf16.gmra.mrb[4].mxu0 %vm359_vm0, %v1972_v35  ;;  %1715 = vmatmul.mubr.msk.bf16.gmra.mrb[4].mxu1 %vm359_vm0, %v1973_v36 }
  0x5c   : > { %427 = vmatprep.mubr.bf16.mxu0 %v2182_v7 }
  0x63   : > { %1713 = vmatmul.mubr.msk.bf16.gmra.mrb[8].mxu0 %vm359_vm0, %v1974_v37 }
  0xc5   : > { %v483_v39 = vpop.permute.xlu1 %482 }
  0xc6   : > { %v473_v40 = vpop.permute.xlu0 %472 }
  0xc9   : > { %v488_v41 = vpop.permute.xlu1 %487 }
  0xca   : > { %v478_v42 = vpop.permute.xlu0 %477 }
  0xcd   : > { %v498_v43 = vpop.permute.xlu1 %497 }
  0xce   : > { %v493_v44 = vpop.permute.xlu0 %492 }
  0xd1   : > { %v508_v60 = vpop.permute.xlu1 %507 }
  0xd4   : > { %v503_v59 = vpop.permute.xlu0 %502 }
 0x126   : > { %v409_v45 = vpop.f32.mrb[0].mxu0  ;;  %v439_v46 = vpop.f32.mrb[0].mxu1 }
 0x127   : > { %v411_v47 = vpop.f32.mrb[1].mxu0  ;;  %v518_v48 = vadd.f32 %v493_v44, %v439_v46  ;;  %v441_v49 = vpop.f32.mrb[1].mxu1 }
 0x128   : > { %v413_v50 = vpop.f32.mrb[2].mxu0  ;;  %v519_v51 = vadd.f32 %v493_v44, %v441_v49  ;;  %v443_v52 = vpop.f32.mrb[2].mxu1 }
 0x129   : > { %v458_v53 = vpack.c.bf16 %v413_v50, %v409_v45  ;;  %v415_v54 = vpop.f32.mrb[3].mxu0  ;;  %534 = vst [vmem:[#allocation3 + $0x40] sm:$0xff] %v518_v48  ;;  %v520_v55 = vadd.f32 %v498_v43, %v443_v52  ;;  %v445_v56 = vpop.f32.mrb[3].mxu1 }
 0x12a   : > { %v459_v57 = vpack.c.bf16 %v415_v54, %v411_v47  ;;  %535 = vst [vmem:[#allocation3 + $0x48] sm:$0xff] %v519_v51  ;;  %v521_v58 = vadd.f32 %v498_v43, %v445_v56 }
 0x12b   : > { %460 = vst [vmem:[#allocation2] sm:$0xff] %v458_v53  ;;  %536 = vst [vmem:[#allocation3 + $0x50] sm:$0xff] %v520_v55 }
 0x12c   : > { %461 = vst [vmem:[#allocation2 + $0x8] sm:$0xff] %v459_v57  ;;  %537 = vst [vmem:[#allocation3 + $0x58] sm:$0xff] %v521_v58 }
 0x12e   : > { %v419_v61 = vpop.f32.mrb[4].mxu0  ;;  %v449_v62 = vpop.f32.mrb[4].mxu1 }
 0x12f   : > { %v510_v63 = vadd.f32 %v473_v40, %v419_v61  ;;  %v522_v0 = vadd.f32 %v503_v59, %v449_v62  ;;  %v421_v1 = vpop.f32.mrb[5].mxu0  ;;  %v451_v2 = vpop.f32.mrb[5].mxu1 }
 0x130   : > { %v511_v3 = vadd.f32 %v473_v40, %v421_v1  ;;  %v523_v4 = vadd.f32 %v503_v59, %v451_v2  ;;  %v423_v5 = vpop.f32.mrb[6].mxu0  ;;  %v453_v6 = vpop.f32.mrb[6].mxu1 }
 0x131   : > { %526 = vst [vmem:[#allocation3] sm:$0xff] %v510_v63  ;;  %538 = vst [vmem:[#allocation3 + $0x60] sm:$0xff] %v522_v0  ;;  %v512_v7 = vadd.f32 %v478_v42, %v423_v5  ;;  %v524_v8 = vadd.f32 %v508_v60, %v453_v6  ;;  %v425_v9 = vpop.f32.mrb[7].mxu0  ;;  %v455_v10 = vpop.f32.mrb[7].mxu1 }
 0x132   : > { %527 = vst [vmem:[#allocation3 + $0x8] sm:$0xff] %v511_v3  ;;  %539 = vst [vmem:[#allocation3 + $0x68] sm:$0xff] %v523_v4  ;;  %v513_v11 = vadd.f32 %v478_v42, %v425_v9  ;;  %v525_v12 = vadd.f32 %v508_v60, %v455_v10 }
 0x133   : > { %528 = vst [vmem:[#allocation3 + $0x10] sm:$0xff] %v512_v7  ;;  %540 = vst [vmem:[#allocation3 + $0x70] sm:$0xff] %v524_v8 }
 0x134   : > { %529 = vst [vmem:[#allocation3 + $0x18] sm:$0xff] %v513_v11  ;;  %541 = vst [vmem:[#allocation3 + $0x78] sm:$0xff] %v525_v12 }
 0x136   : > { %v429_v13 = vpop.f32.mrb[8].mxu0 }
 0x137   : > { %v514_v14 = vadd.f32 %v483_v39, %v429_v13  ;;  %v431_v15 = vpop.f32.mrb[9].mxu0 }
 0x138   : > { %v515_v16 = vadd.f32 %v483_v39, %v431_v15  ;;  %v433_v17 = vpop.f32.mrb[10].mxu0 }
 0x139   : > { %530 = vst [vmem:[#allocation3 + $0x20] sm:$0xff] %v514_v14  ;;  %v516_v18 = vadd.f32 %v488_v41, %v433_v17  ;;  %v435_v19 = vpop.f32.mrb[11].mxu0 }
 0x13a   : > { %531 = vst [vmem:[#allocation3 + $0x28] sm:$0xff] %v515_v16  ;;  %v517_v20 = vadd.f32 %v488_v41, %v435_v19 }
 0x13b   : > { %532 = vst [vmem:[#allocation3 + $0x30] sm:$0xff] %v516_v18 }
 0x13c   : > { %533 = vst [vmem:[#allocation3 + $0x38] sm:$0xff] %v517_v20 }
 0x13d PF: > { %v568_v21 = vld [vmem:[#allocation2] sm:$0xff]  ;;  %s1716_s17 = sshll.u32 %s2161_s24, 7  ;;  %v569_v23 = vld [vmem:[#allocation2 + $0x8] sm:$0xff]  ;;  %vm602_vm1 = vcmask 130048   ;;  %vm1001_vm2 = vcmask 1040384   ;;  %vm2184_vm3 = vmmov 1  }
 0x13e   : > { %570 = vxpose.xlu0.c.b16.start.end [1/1] (short) %v568_v21, 128  ;;  %s2439_s8 = sshra.s32 %s1716_s17, 7  ;;  %vm1735_vm4 = vmpackc.low %vm2184_vm3, %vm1001_vm2  ;;  %p1738_p9 = scmp.ne.s32.totalorder %s2161_s24, 1 }
 0x13f   : > { %s1717_s29 = sshll.u32 %s2439_s8, 3  ;;  %vm1334_vm5 = vcmask (!%p1738_p9), 523264   ;;  %vm1540_vm6 = vcmask (!%p1738_p9), 7168   ;;  %vm1549_vm7 = vcmask (!%p1738_p9), 15360  }
 0x140   : > { %s566_s13 = scalar_lea.vmem [#allocation2], %s1717_s29  ;;  %s984_s9 = scalar_lea.vmem [#allocation3], %s1717_s29 }
 0x141   : > { %v567_v22 = vld [vmem:[%s566_s13] sm:$0xff] }
 0x142   : > { %1814 = vmatprep.subr.bf16.mxu0 %v567_v22 }
 0x143   : > { %1815 = vmatpush3.bf16.msra.mxu0 %v567_v22 }
 0x15b   : > { %586 = vxpose.xlu0.c.b16.start.end [1/1] (short) %v569_v23, 128 }
 0x1a4   : > { %v578_v24 = vpop.trf.xlu0 }
 0x1a5   : > { %1816 = vmatprep.mubr.msk.bf16.mxu0 %vm602_vm1, %v578_v24 }
 0x1a8   : > { %v579_v25 = vpop.trf.xlu0 }
 0x1a9   : > { %1817 = vmatmul.mubr.msk.bf16.vlgmr.msra.gmra.mrb[0].mxu0 %vm602_vm1, %v579_v25 }
 0x1ac   : > { %v580_v26 = vpop.trf.xlu0 }
 0x1ad   : > { %1820 = vmatprep.mubr.msk.bf16.mxu0 %vm602_vm1, %v580_v26 }
 0x1b0   : > { %v581_v27 = vpop.trf.xlu0 }
 0x1b1   : > { %1821 = vmatmul.mubr.msk.bf16.gmra.mrb[4].mxu0 %vm602_vm1, %v581_v27 }
 0x1b4   : > { %v582_v28 = vpop.trf.xlu0 }
 0x1b5   : > { %1824 = vmatprep.mubr.msk.bf16.mxu0 %vm602_vm1, %v582_v28 }
 0x1b8   : > { %v583_v29 = vpop.trf.xlu0 }
 0x1b9   : > { %1825 = vmatmul.mubr.msk.bf16.gmra.mrb[8].mxu0 %vm602_vm1, %v583_v29 }
 0x1bc   : > { %v584_v30 = vpop.trf.xlu0 }
 0x1bd   : > { %1828 = vmatprep.mubr.msk.bf16.mxu0 %vm602_vm1, %v584_v30 }
 0x1c0   : > { %v585_v31 = vpop.trf.xlu0 }
 0x1c1   : > { %1829 = vmatmul.mubr.msk.bf16.gmra.mrb[12].mxu0 %vm602_vm1, %v585_v31 }
 0x1c4   : > { %v594_v32 = vpop.trf.xlu0 }
 0x1c5   : > { %1832 = vmatprep.mubr.msk.bf16.mxu0 %vm602_vm1, %v594_v32 }
 0x1c8   : > { %v595_v33 = vpop.trf.xlu0 }
 0x1c9   : > { %1833 = vmatmul.mubr.msk.bf16.gmra.mrb[16].mxu0 %vm602_vm1, %v595_v33 }
 0x1cc   : > { %v596_v34 = vpop.trf.xlu0 }
 0x1cd   : > { %1836 = vmatprep.mubr.msk.bf16.mxu0 %vm602_vm1, %v596_v34 }
 0x1d0   : > { %v597_v35 = vpop.trf.xlu0 }
 0x1d1   : > { %1837 = vmatmul.mubr.msk.bf16.gmra.mrb[20].mxu0 %vm602_vm1, %v597_v35 }
 0x1d4   : > { %v598_v36 = vpop.trf.xlu0 }
 0x1d5   : > { %1840 = vmatprep.mubr.msk.bf16.mxu0 %vm602_vm1, %v598_v36 }
 0x1d8   : > { %v599_v37 = vpop.trf.xlu0 }
 0x1d9   : > { %1841 = vmatmul.mubr.msk.bf16.gmra.mrb[24].mxu0 %vm602_vm1, %v599_v37 }
 0x1dc   : > { %v600_v38 = vpop.trf.xlu0 }
 0x1dd   : > { %1844 = vmatprep.mubr.msk.bf16.mxu0 %vm602_vm1, %v600_v38 }
 0x1e0   : > { %v601_v39 = vpop.trf.xlu0 }
 0x1e1   : > { %1845 = vmatmul.mubr.msk.bf16.gmra.mrb[28].mxu0 %vm602_vm1, %v601_v39 }
 0x27c   : > { %v2460_v40 = vpop.f32.mrb[0].mxu0 }
 0x27d   : > { %v2462_v41 = vpop.f32.mrb[1].mxu0 }
 0x27e   : > { %v2464_v42 = vpop.f32.mrb[2].mxu0 }
 0x27f   : > { %v2466_v43 = vpop.f32.mrb[3].mxu0 }
 0x284   : > { %v2468_v44 = vpop.f32.mrb[4].mxu0 }
 0x285   : > { %v814_v45 = vmax.f32 %v2460_v40, %v2468_v44  ;;  %v2472_v46 = vpop.f32.mrb[5].mxu0 }
 0x286   : > { %v812_v47 = vmax.f32 %v2462_v41, %v2472_v46  ;;  %v2476_v48 = vpop.f32.mrb[6].mxu0 }
 0x287   : > { %v815_v49 = vmax.f32 %v2464_v42, %v2476_v48  ;;  %v2480_v50 = vpop.f32.mrb[7].mxu0 }
 0x288   : > { %v813_v51 = vmax.f32 %v2466_v43, %v2480_v50 }
 0x28c   : > { %v2484_v52 = vpop.f32.mrb[8].mxu0 }
 0x28d   : > { %v818_v53 = vmax.f32 %v814_v45, %v2484_v52  ;;  %v2487_v54 = vpop.f32.mrb[9].mxu0 }
 0x28e   : > { %v816_v55 = vmax.f32 %v812_v47, %v2487_v54  ;;  %v2490_v56 = vpop.f32.mrb[10].mxu0 }
 0x28f   : > { %v819_v57 = vmax.f32 %v815_v49, %v2490_v56  ;;  %v2493_v58 = vpop.f32.mrb[11].mxu0 }
 0x290   : > { %v817_v59 = vmax.f32 %v813_v51, %v2493_v58 }
 0x294   : > { %v2496_v60 = vpop.f32.mrb[12].mxu0 }
 0x295   : > { %v822_v61 = vmax.f32 %v818_v53, %v2496_v60  ;;  %v2499_v62 = vpop.f32.mrb[13].mxu0 }
 0x296   : > { %v820_v63 = vmax.f32 %v816_v55, %v2499_v62  ;;  %v2502_v0 = vpop.f32.mrb[14].mxu0 }
 0x297   : > { %v823_v1 = vmax.f32 %v819_v57, %v2502_v0  ;;  %v2505_v2 = vpop.f32.mrb[15].mxu0 }
 0x298   : > { %v821_v3 = vmax.f32 %v817_v59, %v2505_v2 }
 0x29c   : > { %v2508_v4 = vpop.f32.mrb[16].mxu0 }
 0x29d   : > { %v826_v5 = vmax.f32 %v822_v61, %v2508_v4  ;;  %v2511_v6 = vpop.f32.mrb[17].mxu0 }
 0x29e   : > { %v824_v7 = vmax.f32 %v820_v63, %v2511_v6  ;;  %v2514_v8 = vpop.f32.mrb[18].mxu0 }
 0x29f   : > { %v827_v9 = vmax.f32 %v823_v1, %v2514_v8  ;;  %v2517_v10 = vpop.f32.mrb[19].mxu0 }
 0x2a0   : > { %v825_v11 = vmax.f32 %v821_v3, %v2517_v10 }
 0x2a4   : > { %v2520_v12 = vpop.f32.mrb[20].mxu0 }
 0x2a5   : > { %v830_v13 = vmax.f32 %v826_v5, %v2520_v12  ;;  %v2523_v14 = vpop.f32.mrb[21].mxu0 }
 0x2a6   : > { %v828_v15 = vmax.f32 %v824_v7, %v2523_v14  ;;  %v2526_v16 = vpop.f32.mrb[22].mxu0 }
 0x2a7   : > { %v831_v17 = vmax.f32 %v827_v9, %v2526_v16  ;;  %v2529_v18 = vpop.f32.mrb[23].mxu0 }
 0x2a8   : > { %v829_v19 = vmax.f32 %v825_v11, %v2529_v18 }
 0x2ac   : > { %v2532_v20 = vpop.f32.mrb[24].mxu0 }
 0x2ad   : > { %v834_v21 = vmax.f32 %v830_v13, %v2532_v20  ;;  %v2535_v22 = vpop.f32.mrb[25].mxu0 }
 0x2ae   : > { %v832_v23 = vmax.f32 %v828_v15, %v2535_v22  ;;  %v2538_v24 = vpop.f32.mrb[26].mxu0 }
 0x2af   : > { %v835_v25 = vmax.f32 %v831_v17, %v2538_v24  ;;  %v2541_v26 = vpop.f32.mrb[27].mxu0 }
 0x2b0   : > { %v833_v27 = vmax.f32 %v829_v19, %v2541_v26 }
 0x2b4   : > { %v2544_v28 = vpop.f32.mrb[28].mxu0 }
 0x2b5   : > { %v838_v29 = vmax.f32 %v834_v21, %v2544_v28  ;;  %v2547_v30 = vpop.f32.mrb[29].mxu0 }
 0x2b6   : > { %v836_v31 = vmax.f32 %v832_v23, %v2547_v30  ;;  %v2550_v32 = vpop.f32.mrb[30].mxu0 }
 0x2b7   : > { %v839_v33 = vmax.f32 %v835_v25, %v2550_v32  ;;  %v2553_v34 = vpop.f32.mrb[31].mxu0 }
 0x2b8   : > { %v837_v35 = vmax.f32 %v833_v27, %v2553_v34 }
 0x2b9   : > { %v841_v36 = vmax.f32 %v838_v29, %v839_v33 }
 0x2ba   : > { %v840_v37 = vmax.f32 %v836_v31, %v837_v35 }
 0x2bc   : > { %v842_v38 = vmax.f32 %v840_v37, %v841_v36 }
 0x2be   : > { %v843_v39 = vrot.slane %v842_v38, 4 }
 0x2c0   : > { %v844_v45 = vmax.f32 %v842_v38, %v843_v39 }
 0x2c2   : > { %v845_v47 = vrot.slane %v844_v45, 2 }
 0x2c4   : > { %v846_v49 = vmax.f32 %v844_v45, %v845_v47 }
 0x2c6   : > { %v847_v51 = vrot.slane %v846_v49, 1 }
 0x2c8   : > { %v2556_v53 = vmax.f32 %v846_v49, %v847_v51 }
 0x2ca   : > { %v849_v55 = vsub.f32 %v2462_v41, %v2556_v53  ;;  %v850_v57 = vsub.f32 %v2466_v43, %v2556_v53  ;;  %v851_v59 = vsub.f32 %v2460_v40, %v2556_v53  ;;  %v852_v61 = vsub.f32 %v2464_v42, %v2556_v53 }
 0x2cb   : > { %v853_v63 = vsub.f32 %v2472_v46, %v2556_v53  ;;  %v854_v1 = vsub.f32 %v2480_v50, %v2556_v53  ;;  %v855_v3 = vsub.f32 %v2468_v44, %v2556_v53  ;;  %v856_v41 = vsub.f32 %v2476_v48, %v2556_v53 }
 0x2cc   : > { %v857_v43 = vsub.f32 %v2487_v54, %v2556_v53  ;;  %v858_v40 = vsub.f32 %v2493_v58, %v2556_v53  ;;  %v859_v42 = vsub.f32 %v2484_v52, %v2556_v53  ;;  %v860_v46 = vsub.f32 %v2490_v56, %v2556_v53 }
 0x2cd   : > { %v861_v50 = vsub.f32 %v2499_v62, %v2556_v53  ;;  %v862_v44 = vsub.f32 %v2505_v2, %v2556_v53  ;;  %v863_v48 = vsub.f32 %v2496_v60, %v2556_v53  ;;  %v864_v54 = vsub.f32 %v2502_v0, %v2556_v53 }
 0x2ce   : > { %v865_v58 = vsub.f32 %v2511_v6, %v2556_v53  ;;  %v866_v52 = vsub.f32 %v2517_v10, %v2556_v53  ;;  %v867_v56 = vsub.f32 %v2508_v4, %v2556_v53  ;;  %v868_v62 = vsub.f32 %v2514_v8, %v2556_v53 }
 0x2cf   : > { %v869_v2 = vsub.f32 %v2523_v14, %v2556_v53  ;;  %v870_v60 = vsub.f32 %v2529_v18, %v2556_v53  ;;  %v871_v0 = vsub.f32 %v2520_v12, %v2556_v53  ;;  %v872_v5 = vsub.f32 %v2526_v16, %v2556_v53 }
 0x2d0   : > { %v873_v6 = vsub.f32 %v2535_v22, %v2556_v53  ;;  %v874_v4 = vsub.f32 %v2541_v26, %v2556_v53  ;;  %v875_v7 = vsub.f32 %v2532_v20, %v2556_v53  ;;  %v876_v8 = vsub.f32 %v2538_v24, %v2556_v53 }
 0x2d1   : > { %v877_v9 = vsub.f32 %v2547_v30, %v2556_v53  ;;  %v878_v10 = vsub.f32 %v2553_v34, %v2556_v53  ;;  %v879_v11 = vsub.f32 %v2544_v28, %v2556_v53  ;;  %v880_v13 = vsub.f32 %v2550_v32, %v2556_v53 }
 0x2d2   : > { %v881_v14 = vmul.f32 1.442695, %v849_v55  ;;  %v883_v15 = vmul.f32 1.442695, %v850_v57  ;;  %v885_v17 = vmul.f32 1.442695, %v851_v59 }
 0x2d3   : > { %v887_v19 = vmul.f32 1.442695, %v852_v61  ;;  %v889_v21 = vmul.f32 1.442695, %v853_v63  ;;  %v891_v23 = vmul.f32 1.442695, %v854_v1 }
 0x2d4   : > { %1975 = vpow2.f32 %v881_v14  ;;  %v893_v25 = vmul.f32 1.442695, %v855_v3  ;;  %v895_v27 = vmul.f32 1.442695, %v856_v41  ;;  %v897_v29 = vmul.f32 1.442695, %v857_v43 }
 0x2d5   : > { %1977 = vpow2.f32 %v883_v15  ;;  %v899_v31 = vmul.f32 1.442695, %v858_v40  ;;  %v901_v33 = vmul.f32 1.442695, %v859_v42  ;;  %v903_v35 = vmul.f32 1.442695, %v860_v46 }
 0x2d6   : > { %1979 = vpow2.f32 %v885_v17  ;;  %v905_v36 = vmul.f32 1.442695, %v861_v50  ;;  %v907_v37 = vmul.f32 1.442695, %v862_v44  ;;  %v909_v39 = vmul.f32 1.442695, %v863_v48 }
 0x2d7   : > { %1981 = vpow2.f32 %v887_v19  ;;  %v911_v47 = vmul.f32 1.442695, %v864_v54  ;;  %v913_v51 = vmul.f32 1.442695, %v865_v58  ;;  %v915_v61 = vmul.f32 1.442695, %v866_v52 }
 0x2d8   : > { %1983 = vpow2.f32 %v889_v21  ;;  %v917_v1 = vmul.f32 1.442695, %v867_v56  ;;  %v919_v40 = vmul.f32 1.442695, %v868_v62  ;;  %v921_v46 = vmul.f32 1.442695, %v869_v2 }
 0x2d9   : > { %1985 = vpow2.f32 %v891_v23  ;;  %v923_v54 = vmul.f32 1.442695, %v870_v60  ;;  %v925_v52 = vmul.f32 1.442695, %v871_v0  ;;  %v927_v2 = vmul.f32 1.442695, %v872_v5 }
 0x2da   : > { %1987 = vpow2.f32 %v893_v25  ;;  %v929_v18 = vmul.f32 1.442695, %v873_v6  ;;  %v931_v0 = vmul.f32 1.442695, %v874_v4  ;;  %v933_v16 = vmul.f32 1.442695, %v875_v7 }
 0x2db   : > { %1989 = vpow2.f32 %v895_v27  ;;  %v935_v6 = vmul.f32 1.442695, %v876_v8  ;;  %v937_v26 = vmul.f32 1.442695, %v877_v9  ;;  %v939_v7 = vmul.f32 1.442695, %v878_v10 }
 0x2dc   : > { %1991 = vpow2.f32 %v897_v29  ;;  %v941_v24 = vmul.f32 1.442695, %v879_v11  ;;  %v943_v9 = vmul.f32 1.442695, %v880_v13 }
 0x2dd   : > { %1993 = vpow2.f32 %v899_v31 }
 0x2de   : > { %v1976_v38 = vpop.eup %1975  ;;  %1995 = vpow2.f32 %v901_v33 }
 0x2df   : > { %v1978_v45 = vpop.eup %1977  ;;  %1997 = vpow2.f32 %v903_v35 }
 0x2e0   : > { %v1980_v49 = vpop.eup %1979  ;;  %1999 = vpow2.f32 %v905_v36  ;;  %v945_v55 = vadd.f32 %v1978_v45, %v1976_v38  ;;  %v2622_v57 = vpack.c.bf16 %v1978_v45, %v1976_v38 }
 0x2e1   : > { %v1982_v59 = vpop.eup %1981  ;;  %2001 = vpow2.f32 %v907_v37 }
 0x2e2   : > { %v1984_v63 = vpop.eup %1983  ;;  %2003 = vpow2.f32 %v909_v39  ;;  %v946_v3 = vadd.f32 %v1980_v49, %v945_v55  ;;  %v2624_v41 = vpack.c.bf16 %v1982_v59, %v1980_v49 }
 0x2e3   : > { %v1986_v43 = vpop.eup %1985  ;;  %2005 = vpow2.f32 %v911_v47 }
 0x2e4   : > { %v1988_v42 = vpop.eup %1987  ;;  %2007 = vpow2.f32 %v913_v51  ;;  %v947_v50 = vadd.f32 %v1982_v59, %v946_v3  ;;  %v2626_v44 = vpack.c.bf16 %v1986_v43, %v1984_v63 }
 0x2e5   : > { %v1990_v48 = vpop.eup %1989  ;;  %2009 = vpow2.f32 %v915_v61 }
 0x2e6   : > { %v1992_v58 = vpop.eup %1991  ;;  %2011 = vpow2.f32 %v917_v1  ;;  %v948_v56 = vadd.f32 %v1984_v63, %v947_v50  ;;  %v2634_v62 = vpack.c.bf16 %v1990_v48, %v1988_v42 }
 0x2e7   : > { %v1994_v14 = vpop.eup %1993  ;;  %2013 = vpow2.f32 %v919_v40 }
 0x2e8   : > { %v1996_v15 = vpop.eup %1995  ;;  %2015 = vpow2.f32 %v921_v46  ;;  %v949_v60 = vadd.f32 %v1986_v43, %v948_v56  ;;  %v2642_v17 = vpack.c.bf16 %v1994_v14, %v1992_v58 }
 0x2e9   : > { %v1998_v12 = vpop.eup %1997  ;;  %2017 = vpow2.f32 %v923_v54 }
 0x2ea   : > { %v2000_v19 = vpop.eup %1999  ;;  %2019 = vpow2.f32 %v925_v52  ;;  %v950_v5 = vadd.f32 %v1988_v42, %v949_v60  ;;  %v2650_v21 = vpack.c.bf16 %v1998_v12, %v1996_v15 }
 0x2eb   : > { %v2002_v22 = vpop.eup %2001  ;;  %2021 = vpow2.f32 %v927_v2 }
 0x2ec   : > { %v2004_v23 = vpop.eup %2003  ;;  %2023 = vpow2.f32 %v929_v18  ;;  %v951_v4 = vadd.f32 %v1990_v48, %v950_v5  ;;  %v2658_v25 = vpack.c.bf16 %v2002_v22, %v2000_v19 }
 0x2ed   : > { %v2006_v20 = vpop.eup %2005  ;;  %2025 = vpow2.f32 %v931_v0 }
 0x2ee   : > { %v2008_v27 = vpop.eup %2007  ;;  %2027 = vpow2.f32 %v933_v16  ;;  %v952_v8 = vadd.f32 %v1992_v58, %v951_v4  ;;  %v2666_v29 = vpack.c.bf16 %v2006_v20, %v2004_v23  ;;  %v990_v4 = vld [vmem:[%s984_s9 + $0x50] sm:$0xff] }
 0x2ef   : > { %v2010_v30 = vpop.eup %2009  ;;  %2029 = vpow2.f32 %v935_v6 }
 0x2f0   : > { %v2012_v31 = vpop.eup %2011  ;;  %2031 = vpow2.f32 %v937_v26  ;;  %v953_v33 = vadd.f32 %v1994_v14, %v952_v8  ;;  %v1036_v34 = vpack.c.bf16 %v2010_v30, %v2008_v27  ;;  %v989_v26 = vld [vmem:[%s984_s9 + $0x40] sm:$0xff] }
 0x2f1   : > { %v2014_v10 = vpop.eup %2013  ;;  %2033 = vpow2.f32 %v939_v7  ;;  %v988_v7 = vld [vmem:[%s984_s9 + $0x30] sm:$0xff] }
 0x2f2   : > { %v2016_v35 = vpop.eup %2015  ;;  %2035 = vpow2.f32 %v941_v24  ;;  %v954_v36 = vadd.f32 %v1996_v15, %v953_v33  ;;  %1788 = vmatprep.subr.bf16.mxu0 %v1036_v34  ;;  %1856 = vmatprep.subr.bf16.mxu1 %v1036_v34  ;;  %v1037_v28 = vpack.c.bf16 %v2014_v10, %v2012_v31 }
 0x2f3   : > { %v2018_v11 = vpop.eup %2017  ;;  %2037 = vpow2.f32 %v943_v9  ;;  %1789 = vmatpush3.bf16.xpose.msra.mxu0 %v2622_v57  ;;  %1864 = vmatpush3.bf16.xpose.msra.mxu1 %v2622_v57 }
 0x2f4   : > { %v2020_v32 = vpop.eup %2019  ;;  %v955_v53 = vadd.f32 %v1998_v12, %v954_v36  ;;  %1790 = vmatprep.subr.bf16.mxu0 %v1037_v28  ;;  %1857 = vmatprep.subr.bf16.mxu1 %v1037_v28  ;;  %v1038_v13 = vpack.c.bf16 %v2018_v11, %v2016_v35 }
 0x2f5   : > { %v2022_v37 = vpop.eup %2021 }
 0x2f6   : > { %v2024_v38 = vpop.eup %2023  ;;  %v956_v39 = vadd.f32 %v2000_v19, %v955_v53  ;;  %v1039_v45 = vpack.c.bf16 %v2022_v37, %v2020_v32 }
 0x2f7   : > { %v2026_v47 = vpop.eup %2025 }
 0x2f8   : > { %v2028_v49 = vpop.eup %2027  ;;  %v957_v51 = vadd.f32 %v2002_v22, %v956_v39  ;;  %v1040_v55 = vpack.c.bf16 %v2026_v47, %v2024_v38  ;;  %v1017_v39 = vld [vmem:[#allocation4 + $0x48] sm:$0xff] }
 0x2f9   : > { %v2030_v59 = vpop.eup %2029 }
 0x2fa   : > { %v2032_v61 = vpop.eup %2031  ;;  %v958_v63 = vadd.f32 %v2004_v23, %v957_v51  ;;  %v1041_v1 = vpack.c.bf16 %v2030_v59, %v2028_v49  ;;  %v986_v23 = vld [vmem:[%s984_s9 + $0x10] sm:$0xff]  ;;  %v1018_v51 = vld [vmem:[#allocation4 + $0x50] sm:$0xff] }
 0x2fb   : > { %v2034_v3 = vpop.eup %2033  ;;  %1791 = vmatpush3.bf16.xpose.msra.mxu0 %v2624_v41  ;;  %1865 = vmatpush3.bf16.xpose.msra.mxu1 %v2624_v41 }
 0x2fc   : > { %v2036_v57 = vpop.eup %2035  ;;  %v959_v43 = vadd.f32 %v2006_v20, %v958_v63  ;;  %1792 = vmatprep.subr.bf16.mxu0 %v1038_v13  ;;  %1858 = vmatprep.subr.bf16.mxu1 %v1038_v13  ;;  %v1042_v40 = vpack.c.bf16 %v2034_v3, %v2032_v61  ;;  %v987_v20 = vld [vmem:[%s984_s9 + $0x20] sm:$0xff]  ;;  %v1008_v13 = vld [vmem:[#allocation4] sm:$0xff] }
 0x2fd   : > { %v2038_v42 = vpop.eup %2037 }
 0x2fe   : > { %v960_v46 = vadd.f32 %v2008_v27, %v959_v43  ;;  %v1043_v50 = vpack.c.bf16 %v2038_v42, %v2036_v57  ;;  %v991_v27 = vld [vmem:[%s984_s9 + $0x60] sm:$0xff] }
 0x300   : > { %v961_v48 = vadd.f32 %v2010_v30, %v960_v46 }
 0x302   : > { %v962_v54 = vadd.f32 %v2012_v31, %v961_v48 }
 0x303   : > { %1793 = vmatpush3.bf16.xpose.msra.mxu0 %v2626_v44  ;;  %1866 = vmatpush3.bf16.xpose.msra.mxu1 %v2626_v44 }
 0x304   : > { %v963_v58 = vadd.f32 %v2014_v10, %v962_v54  ;;  %1794 = vmatprep.subr.bf16.mxu0 %v1039_v45  ;;  %1859 = vmatprep.subr.bf16.mxu1 %v1039_v45 }
 0x306   : > { %v964_v52 = vadd.f32 %v2016_v35, %v963_v58 }
 0x308   : > { %v965_v56 = vadd.f32 %v2018_v11, %v964_v52 }
 0x30a   : > { %v966_v41 = vadd.f32 %v2020_v32, %v965_v56  ;;  %v2185_v32 = vmov 0.0   ;;  %v1012_v56 = vld [vmem:[#allocation4 + $0x20] sm:$0xff] }
 0x30b   : > { %1795 = vmatpush3.bf16.xpose.msra.mxu0 %v2634_v62  ;;  %1867 = vmatpush3.bf16.xpose.msra.mxu1 %v2634_v62 }
 0x30c   : > { %v967_v14 = vadd.f32 %v2022_v37, %v966_v41  ;;  %1796 = vmatprep.subr.bf16.mxu0 %v1040_v55  ;;  %1860 = vmatprep.subr.bf16.mxu1 %v1040_v55  ;;  %v1016_v37 = vld [vmem:[#allocation4 + $0x40] sm:$0xff] }
 0x30d   : > { %v1020_v41 = vld [vmem:[#allocation4 + $0x60] sm:$0xff] }
 0x30e   : > { %v968_v2 = vadd.f32 %v2024_v38, %v967_v14  ;;  %v1009_v38 = vld [vmem:[#allocation4 + $0x8] sm:$0xff] }
 0x30f   : > { %v1013_v14 = vld [vmem:[#allocation4 + $0x28] sm:$0xff] }
 0x310   : > { %v969_v15 = vadd.f32 %v2026_v47, %v968_v2  ;;  %v1021_v2 = vld [vmem:[#allocation4 + $0x68] sm:$0xff] }
 0x312   : > { %v970_v18 = vadd.f32 %v2028_v49, %v969_v15  ;;  %v1010_v49 = vld [vmem:[#allocation4 + $0x10] sm:$0xff] }
 0x313   : > { %1797 = vmatpush3.bf16.xpose.msra.mxu0 %v2642_v17  ;;  %1868 = vmatpush3.bf16.xpose.msra.mxu1 %v2642_v17 }
 0x314   : > { %v971_v44 = vadd.f32 %v2030_v59, %v970_v18  ;;  %1798 = vmatprep.subr.bf16.mxu0 %v1041_v1  ;;  %1861 = vmatprep.subr.bf16.mxu1 %v1041_v1  ;;  %v1011_v1 = vld [vmem:[#allocation4 + $0x18] sm:$0xff] }
 0x316   : > { %v972_v60 = vadd.f32 %v2032_v61, %v971_v44  ;;  %v1014_v44 = vld [vmem:[#allocation4 + $0x30] sm:$0xff] }
 0x318   : > { %v973_v12 = vadd.f32 %v2034_v3, %v972_v60  ;;  %v1019_v3 = vld [vmem:[#allocation4 + $0x58] sm:$0xff]  ;;  %v1022_v60 = vld [vmem:[#allocation4 + $0x70] sm:$0xff] }
 0x31a   : > { %v974_v0 = vadd.f32 %v2036_v57, %v973_v12 }
 0x31b   : > { %1799 = vmatpush3.bf16.xpose.msra.mxu0 %v2650_v21  ;;  %1869 = vmatpush3.bf16.xpose.msra.mxu1 %v2650_v21  ;;  %v985_v21 = vld [vmem:[%s984_s9] sm:$0xff] }
 0x31c   : > { %v975_v62 = vadd.f32 %v2038_v42, %v974_v0  ;;  %1800 = vmatprep.subr.bf16.mxu0 %v1042_v40  ;;  %1862 = vmatprep.subr.bf16.mxu1 %v1042_v40 }
 0x31e   : > { %v976_v19 = vrot.slane %v975_v62, 4 }
 0x320   : > { %v977_v16 = vadd.f32 %v976_v19, %v975_v62 }
 0x322   : > { %v978_v5 = vrot.slane %v977_v16, 2 }
 0x323   : > { %1801 = vmatpush3.bf16.xpose.msra.mxu0 %v2658_v25  ;;  %1870 = vmatpush3.bf16.xpose.msra.mxu1 %v2658_v25  ;;  %v992_v25 = vld [vmem:[%s984_s9 + $0x70] sm:$0xff] }
 0x324   : > { %v979_v17 = vadd.f32 %v978_v5, %v977_v16  ;;  %1802 = vmatprep.subr.bf16.mxu0 %v1043_v50  ;;  %1863 = vmatprep.subr.bf16.mxu1 %v1043_v50  ;;  %v1015_v16 = vld [vmem:[#allocation4 + $0x38] sm:$0xff] }
 0x325   : > { %v1023_v5 = vld [vmem:[#allocation4 + $0x78] sm:$0xff] }
 0x326   : > { %v980_v22 = vrot.slane %v979_v17, 1 }
 0x328   : > { %v981_v6 = vadd.f32 %v980_v22, %v979_v17 }
 0x32a   : > { %2039 = vrcp.f32 %v981_v6 }
 0x32b   : > { %1803 = vmatpush3.bf16.xpose.msra.mxu0 %v2666_v29  ;;  %1871 = vmatpush3.bf16.xpose.msra.mxu1 %v2666_v29 }
 0x334   : > { %v2040_v24 = vpop.eup %2039 }
 0x335   : > { %v993_v8 = vmul.f32 %v2040_v24, %v985_v21  ;;  %v994_v30 = vmul.f32 %v2040_v24, %v986_v23  ;;  %v997_v9 = vmul.f32 %v2040_v24, %v989_v26  ;;  %v998_v31 = vmul.f32 %v2040_v24, %v990_v4 }
 0x336   : > { %v995_v33 = vmul.f32 %v2040_v24, %v987_v20  ;;  %v996_v34 = vmul.f32 %v2040_v24, %v988_v7  ;;  %v999_v10 = vmul.f32 %v2040_v24, %v991_v27  ;;  %v1000_v35 = vmul.f32 %v2040_v24, %v992_v25  ;;  %v1024_v25 = vld [vmem:[#allocation4 + $0x80] sm:$0xff] }
 0x337   : > { %v1003_v29 = vpack.c.bf16 %v994_v30, %v993_v8  ;;  %v1005_v36 = vpack.c.bf16 %v998_v31, %v997_v9  ;;  %v1736_v53 = vpack.c.bf16 %v2185_v32, %v2040_v24  ;;  %v1025_v24 = vld [vmem:[#allocation4 + $0x88] sm:$0xff]  ;;  %v1026_v30 = vld [vmem:[#allocation4 + $0x90] sm:$0xff]  ;;  %v2186_v32 = vmov (!%p1738_p9), 0  }
 0x338   : > { %v1004_v28 = vpack.c.bf16 %v996_v34, %v995_v33  ;;  %v1006_v11 = vpack.c.bf16 %v1000_v35, %v999_v10  ;;  %v1027_v33 = vld [vmem:[#allocation4 + $0x98] sm:$0xff]  ;;  %2042 = vset.pattern.permute.xlu1 (!%p1738_p9), %v2186_v32  ;;  %2041 = vset.pattern.permute.xlu0 (!%p1738_p9), %v2186_v32 }
 0x339   : > { %1804 = vmatprep.mubr.bf16.mxu0 %v1003_v29  ;;  %1808 = vmatprep.mubr.bf16.mxu1 %v1005_v36 }
 0x33a   : > { %1805 = vmatmul.mubr.bf16.vlgmr.msra.gmra.mrb[32].mxu0 %v1003_v29  ;;  %1809 = vmatmul.mubr.bf16.vlgmr.msra.gmra.mrb[0].mxu1 %v1005_v36 }
 0x33b   : > { %1806 = vmatprep.mubr.bf16.mxu0 %v1004_v28  ;;  %1810 = vmatprep.mubr.bf16.mxu1 %v1006_v11 }
 0x342   : > { %1807 = vmatmul.mubr.bf16.gmra.mrb[36].mxu0 %v1004_v28  ;;  %1811 = vmatmul.mubr.bf16.gmra.mrb[4].mxu1 %v1006_v11 }
 0x343   : > { %1812 = vmatprep.mubr.msk.bf16.mxu1 %vm1735_vm4, %v1736_v53  ;;  %1379 = vmatprep.mubr.bf16.mxu0 (!%p1738_p9), %v2186_v32 }
 0x34a   : > { %1813 = vmatmul.mubr.msk.bf16.gmra.mrb[8].mxu1 %vm1735_vm4, %v1736_v53  ;;  %v1192_v53 = vlaneseq (!%p1738_p9) }
 0x34b   : > { %1399 = vmatprep.mubr.bf16.mxu1 (!%p1738_p9), %v2186_v32 }
 0x40d   : > { %v1078_v45 = vpop.f32.mrb[32].mxu0  ;;  %v1098_v47 = vpop.f32.mrb[0].mxu1 }
 0x40e   : > { %v1127_v55 = vadd.f32 %v1078_v45, %v1008_v13  ;;  %v1135_v59 = vadd.f32 %v1098_v47, %v1016_v37  ;;  %v1080_v61 = vpop.f32.mrb[33].mxu0  ;;  %v1100_v63 = vpop.f32.mrb[1].mxu1  ;;  %v1193_v13 = vshrl.u32 (!%p1738_p9), %v1192_v53, 7 }
 0x40f   : > { %v1128_v57 = vadd.f32 %v1080_v61, %v1009_v38  ;;  %v1136_v43 = vadd.f32 %v1100_v63, %v1017_v39  ;;  %v1082_v40 = vpop.f32.mrb[34].mxu0  ;;  %v1102_v42 = vpop.f32.mrb[2].mxu1  ;;  %v1219_v61 = vld [vmem:[%s2354_s19 + $0x8] sm:$0xff] (!%p1738_p9)  ;;  %v1221_v63 = vld [vmem:[%s2354_s19 + $0x18] sm:$0xff] (!%p1738_p9) }
 0x410   : > { %1147 = vst [vmem:[#allocation4] sm:$0xff] %v1127_v55  ;;  %1155 = vst [vmem:[#allocation4 + $0x40] sm:$0xff] %v1135_v59  ;;  %v1129_v46 = vadd.f32 %v1082_v40, %v1010_v49  ;;  %v1137_v50 = vadd.f32 %v1102_v42, %v1018_v51  ;;  %v1084_v48 = vpop.f32.mrb[35].mxu0  ;;  %v1104_v54 = vpop.f32.mrb[3].mxu1  ;;  %v1198_v37 = vsub.s32 (!%p1738_p9), 1, %v1193_v13  ;;  %v1194_v38 = vsub.s32 (!%p1738_p9), 0, %v1193_v13 }
 0x411   : > { %1148 = vst [vmem:[#allocation4 + $0x8] sm:$0xff] %v1128_v57  ;;  %1156 = vst [vmem:[#allocation4 + $0x48] sm:$0xff] %v1136_v43  ;;  %v1130_v58 = vadd.f32 %v1084_v48, %v1011_v1  ;;  %v1138_v52 = vadd.f32 %v1104_v54, %v1019_v3  ;;  %v1218_v1 = vld [vmem:[%s2354_s19] sm:$0xff] (!%p1738_p9)  ;;  %v1220_v3 = vld [vmem:[%s2354_s19 + $0x10] sm:$0xff] (!%p1738_p9) }
 0x412   : > { %1149 = vst [vmem:[#allocation4 + $0x10] sm:$0xff] %v1129_v46  ;;  %1157 = vst [vmem:[#allocation4 + $0x50] sm:$0xff] %v1137_v50  ;;  %v1223_v46 = vld [vmem:[%s2354_s19 + $0x28] sm:$0xff] (!%p1738_p9)  ;;  %v1268_v50 = vld [vmem:[%s2869_s4 + $0x10] sm:$0xff] (!%p1738_p9) }
 0x413   : > { %1150 = vst [vmem:[#allocation4 + $0x18] sm:$0xff] %v1130_v58  ;;  %1158 = vst [vmem:[#allocation4 + $0x58] sm:$0xff] %v1138_v52  ;;  %v1266_v48 = vld [vmem:[%s2869_s4] sm:$0xff] (!%p1738_p9)  ;;  %1286 = vperm.xlu1 (!%p1738_p9), %2042, %v1268_v50  }
 0x414   : > { %1276 = vperm.xlu0 (!%p1738_p9), %2041, %v1266_v48  }
 0x415   : > { %v1088_v15 = vpop.f32.mrb[36].mxu0  ;;  %v1108_v18 = vpop.f32.mrb[4].mxu1 }
 0x416   : > { %v1131_v12 = vadd.f32 %v1088_v15, %v1012_v56  ;;  %v1139_v0 = vadd.f32 %v1108_v18, %v1020_v41  ;;  %v1090_v62 = vpop.f32.mrb[37].mxu0  ;;  %v1110_v19 = vpop.f32.mrb[5].mxu1  ;;  %v1225_v41 = vld [vmem:[%s2354_s19 + $0x38] sm:$0xff] (!%p1738_p9) }
 0x417   : > { %v1132_v17 = vadd.f32 %v1090_v62, %v1013_v14  ;;  %v1140_v22 = vadd.f32 %v1110_v19, %v1021_v2  ;;  %v1092_v6 = vpop.f32.mrb[38].mxu0  ;;  %v1112_v21 = vpop.f32.mrb[6].mxu1  ;;  %v1175_v47 = vld [vmem:[#allocation4] sm:$0xff] (!%p1738_p9)  ;;  %v1224_v2 = vld [vmem:[%s2354_s19 + $0x30] sm:$0xff] (!%p1738_p9)  ;;  %v1269_v62 = vld [vmem:[%s2869_s4 + $0x18] sm:$0xff] (!%p1738_p9) }
 0x418   : > { %1151 = vst [vmem:[#allocation4 + $0x20] sm:$0xff] %v1131_v12  ;;  %1159 = vst [vmem:[#allocation4 + $0x60] sm:$0xff] %v1139_v0  ;;  %v1133_v23 = vadd.f32 %v1092_v6, %v1014_v44  ;;  %v1141_v26 = vadd.f32 %v1112_v21, %v1022_v60  ;;  %v1094_v4 = vpop.f32.mrb[39].mxu0  ;;  %v1114_v20 = vpop.f32.mrb[7].mxu1  ;;  %v1176_v39 = vld [vmem:[#allocation4 + $0x8] sm:$0xff] (!%p1738_p9)  ;;  %v1222_v14 = vld [vmem:[%s2354_s19 + $0x20] sm:$0xff] (!%p1738_p9)  ;;  %1291 = vperm.xlu1 (!%p1738_p9), %2042, %v1269_v62  }
 0x419   : > { %1152 = vst [vmem:[#allocation4 + $0x28] sm:$0xff] %v1132_v17  ;;  %1160 = vst [vmem:[#allocation4 + $0x68] sm:$0xff] %v1140_v22  ;;  %v1134_v7 = vadd.f32 %v1094_v4, %v1015_v16  ;;  %v1142_v27 = vadd.f32 %v1114_v20, %v1023_v5  ;;  %v1177_v49 = vld [vmem:[#allocation4 + $0x10] sm:$0xff] (!%p1738_p9)  ;;  %v1184_v12 = vld [vmem:[#allocation4 + $0x48] sm:$0xff] (!%p1738_p9) }
 0x41a   : > { %1153 = vst [vmem:[#allocation4 + $0x30] sm:$0xff] %v1133_v23  ;;  %1161 = vst [vmem:[#allocation4 + $0x70] sm:$0xff] %v1141_v26  ;;  %v1178_v45 = vld [vmem:[#allocation4 + $0x18] sm:$0xff] (!%p1738_p9)  ;;  %v1183_v22 = vld [vmem:[#allocation4 + $0x40] sm:$0xff] (!%p1738_p9) }
 0x41b   : > { %1154 = vst [vmem:[#allocation4 + $0x38] sm:$0xff] %v1134_v7  ;;  %1162 = vst [vmem:[#allocation4 + $0x78] sm:$0xff] %v1142_v27  ;;  %v1186_v0 = vld [vmem:[#allocation4 + $0x58] sm:$0xff] (!%p1738_p9)  ;;  %v1185_v6 = vld [vmem:[#allocation4 + $0x50] sm:$0xff] (!%p1738_p9) }
 0x41c   : > { %v1267_v21 = vld [vmem:[%s2869_s4 + $0x8] sm:$0xff] (!%p1738_p9)  ;;  %v1227_v7 = vld [vmem:[%s2354_s19 + $0x48] sm:$0xff] (!%p1738_p9) }
 0x41d   : > { %v1118_v8 = vpop.f32.mrb[8].mxu1  ;;  %1170 = sbr.rel (%p1738_p9) target bundleno = 1496 (0x5d8), region = 52  ;;  %v1229_v27 = vld [vmem:[%s2354_s19 + $0x58] sm:$0xff] (!%p1738_p9)  ;;  %1281 = vperm.xlu0 (!%p1738_p9), %2041, %v1267_v21  }
 0x41e   : > { %v1143_v9 = vadd.f32 %v1118_v8, %v1024_v25  ;;  %v1120_v31 = vpop.f32.mrb[9].mxu1 }
 0x41f   : > { %v1144_v34 = vadd.f32 %v1120_v31, %v1025_v24  ;;  %v1122_v10 = vpop.f32.mrb[10].mxu1  ;;  %v1179_v57 = vld [vmem:[#allocation4 + $0x20] sm:$0xff] (!%p1738_p9) }
 0x420   : > { %1163 = vst [vmem:[#allocation4 + $0x80] sm:$0xff] %v1143_v9  ;;  %v1145_v35 = vadd.f32 %v1122_v10, %v1026_v30  ;;  %v1124_v29 = vpop.f32.mrb[11].mxu1  ;;  %v1180_v51 = vld [vmem:[#allocation4 + $0x28] sm:$0xff] (!%p1738_p9)  ;;  %v1226_v31 = vld [vmem:[%s2354_s19 + $0x40] sm:$0xff] (!%p1738_p9) }
 0x421   : > { %1164 = vst [vmem:[#allocation4 + $0x88] sm:$0xff] %v1144_v34  ;;  %v1146_v36 = vadd.f32 %v1124_v29, %v1027_v33  ;;  %v1181_v42 = vld [vmem:[#allocation4 + $0x30] sm:$0xff] (!%p1738_p9)  ;;  %v1188_v25 = vld [vmem:[#allocation4 + $0x68] sm:$0xff] (!%p1738_p9)  ;;  %v1187_v53 = vld [vmem:[#allocation4 + $0x60] sm:$0xff] (!%p1738_p9) }
 0x422   : > { %1165 = vst [vmem:[#allocation4 + $0x90] sm:$0xff] %v1145_v35  ;;  %v1182_v55 = vld [vmem:[#allocation4 + $0x38] sm:$0xff] (!%p1738_p9)  ;;  %v1228_v33 = vld [vmem:[%s2354_s19 + $0x50] sm:$0xff] (!%p1738_p9) }
 0x423   : > { %1166 = vst [vmem:[#allocation4 + $0x98] sm:$0xff] %v1146_v36  ;;  %v1190_v34 = vld [vmem:[#allocation4 + $0x78] sm:$0xff] (!%p1738_p9) }
 0x428   : > { %v1172_v28 = vld [vmem:[#allocation4 + $0x80] ss:$8 sm:$0x3] }
 0x429   : > { %v1173_v11 = vadd.f32 1e-09, %v1172_v28  ;;  %v1231_v28 = vld [vmem:[%s2354_s19 + $0x68] sm:$0xff] }
 0x42b   : > { %2047 = vrcp.f32 %v1173_v11  ;;  %v1233_v11 = vld [vmem:[%s2354_s19 + $0x78] sm:$0xff] }
 0x435   : > { %v2048_v59 = vpop.eup %2047 }
 0x436   : > { %v2698_v43 = vrot.slane %v2048_v59, %v1198_v37  ;;  %v2700_v40 = vrot.slane %v2048_v59, %v1194_v38 }
 0x438   : > { %v1203_v54 = vmul.f32 %v2698_v43, %v1176_v39  ;;  %v1205_v58 = vmul.f32 %v2698_v43, %v1178_v45  ;;  %v1202_v52 = vmul.f32 %v2700_v40, %v1175_v47  ;;  %v1204_v56 = vmul.f32 %v2700_v40, %v1177_v49  ;;  %v1189_v39 = vld [vmem:[#allocation4 + $0x70] sm:$0xff]  ;;  %v1271_v45 = vld [vmem:[%s2869_s4 + $0x28] sm:$0xff] }
 0x439   : > { %v1207_v15 = vmul.f32 %v2698_v43, %v1180_v51  ;;  %v1209_v18 = vmul.f32 %v2698_v43, %v1182_v55  ;;  %v1206_v44 = vmul.f32 %v2700_v40, %v1179_v57  ;;  %v1208_v60 = vmul.f32 %v2700_v40, %v1181_v42  ;;  %v1270_v47 = vld [vmem:[%s2869_s4 + $0x20] sm:$0xff]  ;;  %1301 = vperm.xlu1 %2042, %v1271_v45  }
 0x43a   : > { %v1235_v19 = vsub.f32 %v1219_v61, %v1203_v54  ;;  %v1237_v16 = vsub.f32 %v1221_v63, %v1205_v58  ;;  %v1234_v5 = vsub.f32 %v1218_v1, %v1202_v52  ;;  %v1236_v17 = vsub.f32 %v1220_v3, %v1204_v56  ;;  %v1230_v1 = vld [vmem:[%s2354_s19 + $0x60] sm:$0xff]  ;;  %v1232_v3 = vld [vmem:[%s2354_s19 + $0x70] sm:$0xff]  ;;  %1296 = vperm.xlu0 %2041, %v1270_v47  }
 0x43b   : > { %v1239_v23 = vsub.f32 %v1223_v46, %v1207_v15  ;;  %v1241_v26 = vsub.f32 %v1225_v41, %v1209_v18  ;;  %v1238_v4 = vsub.f32 %v1222_v14, %v1206_v44  ;;  %v1240_v20 = vsub.f32 %v1224_v2, %v1208_v60  ;;  %v1273_v46 = vld [vmem:[%s2869_s4 + $0x38] sm:$0xff]  ;;  %v2043_v52 = vld [vmem:[%s2868_s3] sm:$0xff]   ;;  %v2044_v56 = vld [vmem:[%s2868_s3 + $0x10] sm:$0xff]  }
 0x43c   : > { %v1251_v24 = vpack.c.bf16 %v1237_v16, %v1235_v19  ;;  %v1250_v8 = vpack.c.bf16 %v1236_v17, %v1234_v5  ;;  %v1211_v30 = vmul.f32 %v2698_v43, %v1184_v12  ;;  %v1213_v9 = vmul.f32 %v2698_v43, %v1186_v0  ;;  %v2045_v41 = vld [vmem:[%s2868_s3 + $0x8] sm:$0xff]   ;;  %v2046_v14 = vld [vmem:[%s2868_s3 + $0x18] sm:$0xff]  }
 0x43d   : > { %v1253_v10 = vpack.c.bf16 %v1241_v26, %v1239_v23  ;;  %v1252_v35 = vpack.c.bf16 %v1240_v20, %v1238_v4  ;;  %v1210_v29 = vmul.f32 %v2700_v40, %v1183_v22  ;;  %v1212_v36 = vmul.f32 %v2700_v40, %v1185_v6  ;;  %1311 = vperm.xlu1 %2042, %v1273_v46  }
 0x43e   : > { %1347 = vmatprep.subr.bf16.mxu0 %v1251_v24  ;;  %1872 = vmatprep.subr.bf16.mxu1 %v1251_v24  ;;  %v1243_v13 = vsub.f32 %v1227_v7, %v1211_v30  ;;  %v1245_v37 = vsub.f32 %v1229_v27, %v1213_v9  ;;  %v1215_v38 = vmul.f32 %v2698_v43, %v1188_v25 }
 0x43f   : > { %1348 = vmatpush1.bf16.msra.mxu0 %v1250_v8  ;;  %1876 = vmatpush1.bf16.msra.mxu1 %v1250_v8  ;;  %v1242_v49 = vsub.f32 %v1226_v31, %v1210_v29  ;;  %v1244_v51 = vsub.f32 %v1228_v33, %v1212_v36  ;;  %v1217_v55 = vmul.f32 %v2698_v43, %v1190_v34  ;;  %v1272_v43 = vld [vmem:[%s2869_s4 + $0x30] sm:$0xff] }
 0x440   : > { %1349 = vmatprep.subr.bf16.mxu0 %v1253_v10  ;;  %1873 = vmatprep.subr.bf16.mxu1 %v1253_v10  ;;  %v1255_v59 = vpack.c.bf16 %v1245_v37, %v1243_v13  ;;  %v1247_v61 = vsub.f32 %v1231_v28, %v1215_v38  ;;  %v1214_v63 = vmul.f32 %v2700_v40, %v1187_v53 }
 0x441   : > { %v1249_v57 = vsub.f32 %v1233_v11, %v1217_v55  ;;  %v1216_v42 = vmul.f32 %v2700_v40, %v1189_v39  ;;  %v1254_v50 = vpack.c.bf16 %v1244_v51, %v1242_v49  ;;  %1306 = vperm.xlu0 %2041, %v1272_v43  }
 0x442   : > { %v1246_v48 = vsub.f32 %v1230_v1, %v1214_v63 }
 0x443   : > { %1350 = vmatpush1.bf16.msra.mxu0 %v1252_v35  ;;  %1877 = vmatpush1.bf16.msra.mxu1 %v1252_v35  ;;  %v1248_v54 = vsub.f32 %v1232_v3, %v1216_v42  ;;  %v1257_v58 = vpack.c.bf16 %v1249_v57, %v1247_v61 }
 0x444   : > { %1351 = vmatprep.subr.bf16.mxu0 %v1255_v59  ;;  %1874 = vmatprep.subr.bf16.mxu1 %v1255_v59 }
 0x445   : > { %v1256_v40 = vpack.c.bf16 %v1248_v54, %v1246_v48 }
 0x447   : > { %1352 = vmatpush1.bf16.msra.mxu0 %v1254_v50  ;;  %1878 = vmatpush1.bf16.msra.mxu1 %v1254_v50 }
 0x448   : > { %1353 = vmatprep.subr.bf16.mxu0 %v1257_v58  ;;  %1875 = vmatprep.subr.bf16.mxu1 %v1257_v58 }
 0x44b   : > { %1354 = vmatpush1.bf16.msra.mxu0 %v1256_v40  ;;  %1879 = vmatpush1.bf16.msra.mxu1 %v1256_v40 }
 0x44e   : > { %1743 = vmatmul.mubr.msk.bf16.vlgmr.msra.gmra.mrb[0].mxu0 %vm1334_vm5, %v2043_v52  ;;  %1745 = vmatmul.mubr.msk.bf16.vlgmr.msra.gmra.mrb[0].mxu1 %vm1334_vm5, %v2044_v56 }
 0x44f   : > { %1389 = vmatprep.mubr.bf16.mxu0 %v2186_v32  ;;  %1409 = vmatprep.mubr.bf16.mxu1 %v2186_v32 }
 0x456   : > { %1744 = vmatmul.mubr.msk.bf16.gmra.mrb[4].mxu0 %vm1334_vm5, %v2045_v41  ;;  %1746 = vmatmul.mubr.msk.bf16.gmra.mrb[4].mxu1 %vm1334_vm5, %v2046_v14 }
 0x492   : > { %v1287_v2 = vpop.permute.xlu1 %1286 }
 0x493   : > { %v1277_v15 = vpop.permute.xlu0 %1276 }
 0x497   : > { %v2768_v18 = vpop.permute.xlu1 %1291 }
 0x49c   : > { %v1282_v44 = vpop.permute.xlu0 %1281 }
 0x4b8   : > { %v1302_v60 = vpop.permute.xlu1 %1301 }
 0x4b9   : > { %v1297_v12 = vpop.permute.xlu0 %1296 }
 0x4bc   : > { %v1312_v28 = vpop.permute.xlu1 %1311 }
 0x4c0   : > { %v1307_v11 = vpop.permute.xlu0 %1306 }
 0x521   : > { %v1381_v0 = vpop.f32.mrb[0].mxu0  ;;  %v1401_v62 = vpop.f32.mrb[0].mxu1 }
 0x522   : > { %v1382_v32 = vadd.f32 %v1381_v0, %v1277_v15  ;;  %v1402_v19 = vadd.f32 %v1401_v62, %v1297_v12  ;;  %v1383_v16 = vpop.f32.mrb[1].mxu0  ;;  %v1403_v5 = vpop.f32.mrb[1].mxu1 }
 0x523   : > { %v1384_v17 = vadd.f32 %v1383_v16, %v1277_v15  ;;  %v1404_v22 = vadd.f32 %v1403_v5, %v1297_v12  ;;  %v1385_v6 = vpop.f32.mrb[2].mxu0  ;;  %v1405_v21 = vpop.f32.mrb[2].mxu1 }
 0x524   : > { %v1386_v23 = vadd.f32 %v1385_v6, %v1282_v44  ;;  %v1406_v26 = vadd.f32 %v1405_v21, %v1302_v60  ;;  %v1387_v4 = vpop.f32.mrb[3].mxu0  ;;  %v1407_v20 = vpop.f32.mrb[3].mxu1  ;;  %v1500_v7 = vmul.f32 %v1382_v32, %v1382_v32  ;;  %v1508_v27 = vmul.f32 %v1402_v19, %v1402_v19 }
 0x525   : > { %v1762_v25 = vpack.c.bf16 %v1384_v17, %v1382_v32  ;;  %v1766_v24 = vpack.c.bf16 %v1404_v22, %v1402_v19  ;;  %v1388_v8 = vadd.f32 %v1387_v4, %v1282_v44  ;;  %v1408_v30 = vadd.f32 %v1407_v20, %v1302_v60 }
 0x526   : > { %v1488_v9 = vadd.f32 %v1404_v22, %v1402_v19  ;;  %v1476_v31 = vadd.f32 %v1384_v17, %v1382_v32  ;;  %v1501_v33 = vmul.f32 %v1384_v17, %v1384_v17  ;;  %v1502_v34 = vmul.f32 %v1386_v23, %v1386_v23 }
 0x527   : > { %1468 = vst [vmem:[%s2368_s10] sm:$0xff] %v1762_v25  ;;  %1472 = vst [vmem:[%s2368_s10 + $0x20] sm:$0xff] %v1766_v24  ;;  %v1763_v10 = vpack.c.bf16 %v1388_v8, %v1386_v23  ;;  %v1767_v35 = vpack.c.bf16 %v1408_v30, %v1406_v26  ;;  %v1479_v29 = vadd.f32 %v1388_v8, %v1386_v23 }
 0x528   : > { %v1491_v36 = vadd.f32 %v1408_v30, %v1406_v26  ;;  %1489 = vadd.xlane.f32.xlu1 %v1488_v9  ;;  %1477 = vadd.xlane.f32.xlu0 %v1476_v31  ;;  %v1516_v53 = vadd.f32 %v1501_v33, %v1500_v7  ;;  %v1503_v13 = vmul.f32 %v1388_v8, %v1388_v8 }
 0x529   : > { %v1509_v37 = vmul.f32 %v1404_v22, %v1404_v22  ;;  %1469 = vst [vmem:[%s2368_s10 + $0x8] sm:$0xff] %v1763_v10  ;;  %1473 = vst [vmem:[%s2368_s10 + $0x28] sm:$0xff] %v1767_v35  ;;  %v1391_v38 = vpop.f32.mrb[4].mxu0  ;;  %v1411_v39 = vpop.f32.mrb[4].mxu1  ;;  %v1510_v45 = vmul.f32 %v1406_v26, %v1406_v26  ;;  %v1511_v47 = vmul.f32 %v1408_v30, %v1408_v30 }
 0x52a   : > { %v1392_v49 = vadd.f32 %v1391_v38, %v1287_v2  ;;  %v1412_v51 = vadd.f32 %v1411_v39, %v1307_v11  ;;  %v1393_v55 = vpop.f32.mrb[5].mxu0  ;;  %v1413_v59 = vpop.f32.mrb[5].mxu1  ;;  %v1519_v61 = vadd.f32 %v1503_v13, %v1502_v34 }
 0x52b   : > { %v1528_v63 = vadd.f32 %v1509_v37, %v1508_v27  ;;  %v1394_v1 = vadd.f32 %v1393_v55, %v1287_v2  ;;  %v1414_v3 = vadd.f32 %v1413_v59, %v1307_v11  ;;  %v1395_v57 = vpop.f32.mrb[6].mxu0  ;;  %v1415_v42 = vpop.f32.mrb[6].mxu1  ;;  %v1531_v46 = vadd.f32 %v1511_v47, %v1510_v45 }
 0x52c   : > { %v1396_v43 = vadd.f32 %v1395_v57, %v2768_v18  ;;  %v1416_v50 = vadd.f32 %v1415_v42, %v1312_v28  ;;  %1480 = vadd.xlane.f32.xlu1 %v1479_v29  ;;  %1492 = vadd.xlane.f32.xlu0 %v1491_v36  ;;  %v1397_v48 = vpop.f32.mrb[7].mxu0  ;;  %v1417_v54 = vpop.f32.mrb[7].mxu1  ;;  %v1504_v58 = vmul.f32 %v1392_v49, %v1392_v49 }
 0x52d   : > { %v1764_v40 = vpack.c.bf16 %v1394_v1, %v1392_v49  ;;  %v1768_v52 = vpack.c.bf16 %v1414_v3, %v1412_v51  ;;  %v1398_v56 = vadd.f32 %v1397_v48, %v2768_v18  ;;  %v1418_v41 = vadd.f32 %v1417_v54, %v1312_v28 }
 0x52e   : > { %v1494_v14 = vadd.f32 %v1414_v3, %v1412_v51  ;;  %v1482_v2 = vadd.f32 %v1394_v1, %v1392_v49  ;;  %v1505_v15 = vmul.f32 %v1394_v1, %v1394_v1  ;;  %v1512_v44 = vmul.f32 %v1412_v51, %v1412_v51 }
 0x52f   : > { %1470 = vst [vmem:[%s2368_s10 + $0x10] sm:$0xff] %v1764_v40  ;;  %1474 = vst [vmem:[%s2368_s10 + $0x30] sm:$0xff] %v1768_v52  ;;  %v1765_v60 = vpack.c.bf16 %v1398_v56, %v1396_v43  ;;  %v1769_v12 = vpack.c.bf16 %v1418_v41, %v1416_v50  ;;  %v1485_v0 = vadd.f32 %v1398_v56, %v1396_v43 }
 0x530   : > { %v1513_v62 = vmul.f32 %v1414_v3, %v1414_v3  ;;  %1517 = vadd.xlane.f32.xlu1 %v1516_v53  ;;  %1520 = vadd.xlane.f32.xlu0 %v1519_v61  ;;  %v1522_v32 = vadd.f32 %v1505_v15, %v1504_v58  ;;  %v1497_v19 = vadd.f32 %v1418_v41, %v1416_v50 }
 0x531   : > { %v1506_v16 = vmul.f32 %v1396_v43, %v1396_v43  ;;  %1471 = vst [vmem:[%s2368_s10 + $0x18] sm:$0xff] %v1765_v60  ;;  %1475 = vst [vmem:[%s2368_s10 + $0x38] sm:$0xff] %v1769_v12  ;;  %v1507_v5 = vmul.f32 %v1398_v56, %v1398_v56  ;;  %v1514_v17 = vmul.f32 %v1416_v50, %v1416_v50 }
 0x532   : > { %v1534_v18 = vadd.f32 %v1513_v62, %v1512_v44  ;;  %v1515_v22 = vmul.f32 %v1418_v41, %v1418_v41 }
 0x533   : > { %v1525_v6 = vadd.f32 %v1507_v5, %v1506_v16 }
 0x534   : > { %v1537_v21 = vadd.f32 %v1515_v22, %v1514_v17  ;;  %1529 = vadd.xlane.f32.xlu1 %v1528_v63  ;;  %1532 = vadd.xlane.f32.xlu0 %v1531_v46 }
 0x538   : > { %1495 = vadd.xlane.f32.xlu1 %v1494_v14  ;;  %1483 = vadd.xlane.f32.xlu0 %v1482_v2 }
 0x53c   : > { %1523 = vadd.xlane.f32.xlu1 %v1522_v32  ;;  %1486 = vadd.xlane.f32.xlu0 %v1485_v0 }
 0x540   : > { %1535 = vadd.xlane.f32.xlu1 %v1534_v18  ;;  %1498 = vadd.xlane.f32.xlu0 %v1497_v19 }
 0x544   : > { %1526 = vadd.xlane.f32.xlu0 %v1525_v6 }
 0x548   : > { %1538 = vadd.xlane.f32.xlu0 %v1537_v21 }
 0x5b5   : > { %v1490_v23 = vpop.xlane.xlu1 %1489  ;;  %v1478_v26 = vpop.xlane.xlu0 %1477 }
 0x5b9   : > { %v1481_v4 = vpop.xlane.xlu1 %1480  ;;  %v1493_v20 = vpop.xlane.xlu0 %1492 }
 0x5bd   : > { %v1518_v7 = vpop.xlane.xlu1 %1517  ;;  %v1521_v27 = vpop.xlane.xlu0 %1520 }
 0x5be   : > { %v1541_v25 = vsel %vm1540_vm6, %v1478_v26, %v1518_v7  ;;  %v1542_v24 = vsel %vm1540_vm6, %v1481_v4, %v1521_v27 }
 0x5bf   : > { %1550 = vst.msk [vmem:[%s2366_s18] sm:$0xff] %vm1549_vm7, %v1541_v25  ;;  %1551 = vst.msk [vmem:[%s2366_s18 + $0x8] sm:$0xff] %vm1549_vm7, %v1542_v24 }
 0x5c1   : > { %v1530_v8 = vpop.xlane.xlu1 %1529  ;;  %v1533_v30 = vpop.xlane.xlu0 %1532 }
 0x5c2   : > { %v1545_v9 = vsel %vm1540_vm6, %v1490_v23, %v1530_v8  ;;  %v1546_v31 = vsel %vm1540_vm6, %v1493_v20, %v1533_v30 }
 0x5c3   : > { %1554 = vst.msk [vmem:[%s2366_s18 + $0x20] sm:$0xff] %vm1549_vm7, %v1545_v9  ;;  %1555 = vst.msk [vmem:[%s2366_s18 + $0x28] sm:$0xff] %vm1549_vm7, %v1546_v31 }
 0x5c5   : > { %v1496_v33 = vpop.xlane.xlu1 %1495  ;;  %v1484_v34 = vpop.xlane.xlu0 %1483 }
 0x5c9   : > { %v1524_v10 = vpop.xlane.xlu1 %1523  ;;  %v1487_v35 = vpop.xlane.xlu0 %1486 }
 0x5ca   : > { %v1543_v29 = vsel %vm1540_vm6, %v1484_v34, %v1524_v10 }
 0x5cb   : > { %1552 = vst.msk [vmem:[%s2366_s18 + $0x10] sm:$0xff] %vm1549_vm7, %v1543_v29 }
 0x5cd   : > { %v1536_v36 = vpop.xlane.xlu1 %1535  ;;  %v1499_v28 = vpop.xlane.xlu0 %1498 }
 0x5ce   : > { %v1547_v11 = vsel %vm1540_vm6, %v1496_v33, %v1536_v36 }
 0x5cf   : > { %1556 = vst.msk [vmem:[%s2366_s18 + $0x30] sm:$0xff] %vm1549_vm7, %v1547_v11 }
 0x5d1   : > { %v1527_v53 = vpop.xlane.xlu0 %1526 }
 0x5d2   : > { %v1544_v13 = vsel %vm1540_vm6, %v1487_v35, %v1527_v53 }
 0x5d3   : > { %1553 = vst.msk [vmem:[%s2366_s18 + $0x18] sm:$0xff] %vm1549_vm7, %v1544_v13 }
 0x5d5   : > { %v1539_v37 = vpop.xlane.xlu0 %1538 }
 0x5d6   : > { %v1548_v38 = vsel %vm1540_vm6, %v1499_v28, %v1539_v37 }
 0x5d7   : > { %1557 = vst.msk [vmem:[%s2366_s18 + $0x38] sm:$0xff] %vm1549_vm7, %v1548_v38 }
 0x5d8 PF: > { %s1770_s8 = sshll.u32 %s2165_s25, 10  ;;  %s1577_s9 = sshll.u32 %s2368_s10, 4  ;;  %s2811_s9 = int_to_ptr.vmem [resolvable:$true] %s1577_s9 }
 0x5d9   : > { %s2808_s13 = scalar_lea.hbm %s2870_s5, %s1770_s8  ;;  %s1559_s24 = scalar_lea.sflag [#allocation7], %s2350_s30 }
 0x5da   : > { %s2079_s20 = scalar_lea.vmem %s2811_s9, 1024  ;;  %p2881_p12 = scmp.ne.s32.totalorder %s2877_s12, 0 }
 0x5db   : > { %p2080_p0 = scmp.ne.s32.totalorder %s2811_s9, %s2079_s20  ;;  %s2187_s18 = smov [#allocation8]  }
 0x5dc   : > { %s2083_s11 = sshll.u32 %s2187_s18, 4  ;;  %s2084_s11 = int_to_ptr.vmem [resolvable:$false] %s2083_s11 }
 0x5dd   : > { %p2081_p13 = pnand %p2080_p0, %p2881_p12  ;;  %s2085_s25 = scalar_lea.vmem %s2084_s11, 2048 }
 0x5de   : > { %p2086_p5 = scmp.lt.s32.totalorder %s2811_s9, %s2084_s11  ;;  %p2087_p3 = scmp.lt.s32.totalorder %s2085_s25, %s2079_s20 }
 0x5df   : > { %p2082_p2 = pneg %p2081_p13 }
 0x5e0   : > { %p2088_p7 = por %p2087_p3, %p2086_p5 }
 0x5e2   : > { %p2089_p8 = pnand %p2088_p7, %p2082_p2 }
 0x5e4   : > { %2092 = shalt.err (!%p2089_p8)
}
 0x5e5   : > { %s2093_s10 = scalar_lea.hbm %s2808_s13, 1024  ;;  %s2097_s8 = scalar_lea.hbm %s2870_s5, 2048 }
 0x5e6   : > { %p2094_p1 = scmp.ne.s32.totalorder %s2808_s13, %s2093_s10  ;;  %p2098_p10 = scmp.lt.u32.totalorder %s2808_s13, %s2870_s5 }
 0x5e7   : > { %p2099_p11 = scmp.lt.u32.totalorder %s2097_s8, %s2093_s10  ;;  %p2101_p0 = scmp.lt.u32.totalorder %s2093_s10, %s2808_s13 }
 0x5e8   : > { %p2095_p4 = pnand %p2094_p1, %p2881_p12 }
 0x5e9   : > { %p2100_p9 = por %p2099_p11, %p2098_p10 }
 0x5ea   : > { %p2096_p6 = pneg %p2095_p4 }
 0x5eb   : > { %p2102_p13 = por %p2101_p0, %p2100_p9 }
 0x5ed   : > { %p2103_p2 = pnand %p2102_p13, %p2096_p6 }
 0x5ef   : > { %2106 = shalt.err (!%p2103_p2)
}
 0x5f0   : > { %s2188_s20 = smov 128   ;;  %s2189_s18 = smov 8  }
 0x5f1   : > { %1882 = dma.vmem_to_hbm [thread:$0]  (%p2881_p12), %s2811_s9, 1024, %s2808_s13, %s1559_s24, %s2188_s20, %s2188_s20, %s2189_s18  }
 0x5f2 PF: > { %p1893_p5 = scmp.ge.s32.totalorder %s2177_s28, 2  ;;  %s1595_s11 = sand.u32 1, %s2149_s21  }
 0x5f3   : > { %p2882_p3 = scmp.ne.s32.totalorder %s2878_s14, 0  ;;  %s1596_s25 = scalar_lea.sflag [#allocation7], %s1595_s11 }
 0x5f5   : > { %p1889_p7 = pnand %p1893_p5, %p2882_p3 }
 0x5f7   : > { %2144 = dma.done.wait (!%p1889_p7), %s1596_s25, 1024  }
 0x5f8   : > { %2146 = vsyncadd (!%p1889_p7), %s1596_s25, 4294966272  ;;  %s23_s28 = sadd.s32 1, %s2177_s28   ;;  %s2883_s12 = sld [smem:[#allocation11_spill]] }
 0x5f9   : > { %p20_p8 = scmp.ge.s32.totalorder %s23_s28, 6   ;;  %s2884_s21 = smov %s2153_s22 }
 0x5fa   : > { %s2885_s22 = smov %s2157_s23  ;;  %s2886_s23 = smov %s2301_s16 }
 0x5fb   : > { %s2887_s24 = smov %s2169_s26  ;;  %s2888_s25 = smov %s2173_s27 }
 0x5fc   : > { %s2889_s26 = smov %s2892_s7  ;;  %22 = sbr.rel (!%p20_p8) target bundleno = 7 (0x7), region = 108 }
 0x5fe   : > { %s2890_s27 = smov %s2883_s12 }
 0x603   :  { %1609 = vsyncpa [#allocation6], 1 }
 0x604   :  { %1611 = vsyncpa [#allocation6 + $0x1], 1 }
 0x605   :  { %1612 = vsyncpa [#allocation7], 1 }
 0x606   :  { %1614 = vsyncpa [#allocation7 + $0x1], 1 }

</bundles_post_ra>
